<compile_context>
chip_gen: v7x
topology: tpu7x:2x2x1
jax: 0.10.0
libtpu: 0.0.40
codegen_flags: <defaults>
</compile_context>

<pallas_src>
import jax
import jax.numpy as jnp
from jax.experimental import pallas as pl
from jax.experimental.pallas import tpu as pltpu


# ---------------------------------------------------------------------------
# Fused conv3x3 + (folded) BN + ReLU kernel
# ---------------------------------------------------------------------------
def conv3x3_bn_relu_kernel(xp_ref, w_ref, b_ref, o_ref):
    # xp_ref: (B_BLK, H+2, W+2, C_in)  zero-padded NHWC input block
    # w_ref : (9, C_in, C_out)         BN-folded conv weights, tap-major
    # b_ref : (1, C_out)               BN-folded bias
    # o_ref : (B_BLK, H, W, C_out)     ReLU(conv(x) * bn_scale + bn_shift)
    bb, oh, ow, cout = o_ref.shape
    cin = xp_ref.shape[-1]
    m = bb * oh * ow                   # batch folded into the matmul M dim

    acc = jnp.zeros((m, cout), jnp.float32)
    # 9 shifted-window taps of the 3x3 kernel, statically unrolled; each tap is
    # one MXU contraction over C_in with the full batch block as M.
    for t in range(9):
        ky, kx = t // 3, t % 3
        patch = xp_ref[:, ky:ky + oh, kx:kx + ow, :].reshape(m, cin)
        acc = acc + jnp.dot(patch, w_ref[t],
                            preferred_element_type=jnp.float32)

    y = jnp.maximum(acc + b_ref[...], 0.0)       # conv + folded BN + ReLU
    # TODO(synk): Dropout(p) is identity in eval mode; a training-mode mask via
    # pltpu.prng_seed / pltpu.prng_random_bits is not implemented here.
    o_ref[...] = y.reshape(bb, oh, ow, cout).astype(o_ref.dtype)


# ---------------------------------------------------------------------------
# Plain-JAX glue: fold eval-mode BatchNorm2d into the conv, layout handling
# ---------------------------------------------------------------------------
def fold_conv_bn_params(conv_w, conv_b, gamma, beta, running_mean, running_var,
                        *, use_bn=True, eps=1e-5):
    """Fold eval-mode BN into conv weights; return tap-major kernel layout."""
    cout, cin, kh, kw = conv_w.shape
    if use_bn:
        scale = gamma / jnp.sqrt(running_var + eps)
        shift = beta - running_mean * scale
    else:                                        # Identity norm layer
        scale = jnp.ones((cout,), conv_w.dtype)
        shift = jnp.zeros((cout,), conv_w.dtype)
    w_f = conv_w * scale[:, None, None, None]    # (C_out, C_in, 3, 3)
    b_f = conv_b * scale + shift                 # (C_out,)
    # (ky, kx, C_in, C_out) -> (9, C_in, C_out): tap-major, C_out on lanes
    w_taps = jnp.transpose(w_f, (2, 3, 1, 0)).reshape(kh * kw, cin, cout)
    return w_taps, b_f.reshape(1, cout)


def conv2d_bn_forward(x_nchw, w_taps, bias, *, block_b=8):
    """x_nchw: (N, C_in, H, W) float32 -> (N, C_out, H, W), eval semantics."""
    n, cin, h, w = x_nchw.shape
    ntaps, _, cout = w_taps.shape
    assert ntaps == 9

    # Largest batch block that divides N (tiny here; for large images this
    # should also be capped against the per-generation VMEM budget, ~8 MiB per
    # double-buffered input on v7x).
    b_blk = min(block_b, n)
    while n % b_blk:
        b_blk -= 1

    # NCHW -> NHWC (channels on lanes) + one-time spatial zero padding.
    x_nhwc = jnp.transpose(x_nchw, (0, 2, 3, 1))
    xp = jnp.pad(x_nhwc, ((0, 0), (1, 1), (1, 1), (0, 0)))

    y_nhwc = pl.pallas_call(
        conv3x3_bn_relu_kernel,
        out_shape=jax.ShapeDtypeStruct((n, h, w, cout), jnp.float32),
        grid=(n // b_blk,),
        in_specs=[
            pl.BlockSpec((b_blk, h + 2, w + 2, cin), lambda i: (i, 0, 0, 0)),
            pl.BlockSpec((9, cin, cout), lambda i: (0, 0, 0)),
            pl.BlockSpec((1, cout), lambda i: (0, 0)),
        ],
        out_specs=pl.BlockSpec((b_blk, h, w, cout), lambda i: (i, 0, 0, 0)),
        compiler_params=pltpu.CompilerParams(
            dimension_semantics=("parallel",)),
    )(xp, w_taps, bias)

    return jnp.transpose(y_nhwc, (0, 3, 1, 2))   # back to PyTorch NCHW


# ---------------------------------------------------------------------------
# Deterministic parameter init (shapes from the module __init__)
# ---------------------------------------------------------------------------
def init_params(key, cin, cout):
    ks = jax.random.split(key, 6)
    bound = 1.0 / ((cin * 9) ** 0.5)             # torch Conv2d default init
    conv_w = jax.random.uniform(ks[0], (cout, cin, 3, 3), jnp.float32,
                                -bound, bound)
    conv_b = jax.random.uniform(ks[1], (cout,), jnp.float32, -bound, bound)
    gamma = jax.random.uniform(ks[2], (cout,), jnp.float32, 0.8, 1.2)
    beta = jax.random.normal(ks[3], (cout,), jnp.float32) * 0.1
    running_mean = jax.random.normal(ks[4], (cout,), jnp.float32) * 0.1
    running_var = jax.random.uniform(ks[5], (cout,), jnp.float32, 0.5, 1.5)
    return conv_w, conv_b, gamma, beta, running_mean, running_var


# ---------------------------------------------------------------------------
# Pure-JAX reference (mirrors the PyTorch forward, eval mode)
# ---------------------------------------------------------------------------
def reference_forward(x_nchw, params, *, use_bn=True, eps=1e-5):
    conv_w, conv_b, gamma, beta, mean, var = params
    y = jax.lax.conv_general_dilated(
        x_nchw, conv_w, window_strides=(1, 1), padding=((1, 1), (1, 1)),
        dimension_numbers=("NCHW", "OIHW", "NCHW"),
        precision=jax.lax.Precision.HIGHEST)
    y = y + conv_b[None, :, None, None]
    if use_bn:
        y = (y - mean[None, :, None, None]) / jnp.sqrt(
            var[None, :, None, None] + eps)
        y = y * gamma[None, :, None, None] + beta[None, :, None, None]
    y = jnp.maximum(y, 0.0)                      # ReLU; Dropout eval = identity
    return y


if __name__ == "__main__":
    # Small shapes consistent with the module's forward: x is (N, C_in, H, W).
    n, cin, hh, ww = 2, 4, 16, 16
    cout = 32
    use_bn = True
    dropout_p = 0.25                             # eval mode -> identity

    key = jax.random.PRNGKey(0)
    kx, kp = jax.random.split(key)
    x = jax.random.normal(kx, (n, cin, hh, ww), jnp.float32)
    params = init_params(kp, cin, cout)

    w_taps, bias = fold_conv_bn_params(*params, use_bn=use_bn)
    out = conv2d_bn_forward(x, w_taps, bias)
    out = jax.block_until_ready(out)

    ref = jax.block_until_ready(reference_forward(x, params, use_bn=use_bn))

    assert out.shape == (n, cout, hh, ww)
    assert jnp.allclose(out, ref, atol=1e-4, rtol=1e-4)
    print("KERNEL_OK")
</pallas_src>

<mosaic_0001>
module attributes {stable_mosaic.version = 11 : i64} {
  func.func @conv3x3_bn_relu_kernel(%arg0: i32, %arg1: memref<2x18x18x4xf32, #tpu.memory_space<vmem>>, %arg2: memref<9x4x32xf32, #tpu.memory_space<vmem>>, %arg3: memref<1x32xf32, #tpu.memory_space<vmem>>, %arg4: memref<2x16x16x32xf32, #tpu.memory_space<vmem>>) attributes {dimension_semantics = [#tpu.dimension_semantics<parallel>], iteration_bounds = array<i64: 1>, scalar_prefetch = 0 : i64, scratch_operands = 0 : i64, tpu.core_type = #tpu.core_type<tc>, window_params = [{transform_indices = @transform_0, window_bounds = array<i64: 2, 18, 18, 4>}, {pipeline_mode = #tpu.pipeline_mode<synchronous>, transform_indices = @transform_1, window_bounds = array<i64: 9, 4, 32>}, {pipeline_mode = #tpu.pipeline_mode<synchronous>, transform_indices = @transform_2, window_bounds = array<i64: 1, 32>}, {transform_indices = @transform_3, window_bounds = array<i64: 2, 16, 16, 32>}]} {
    %cst = arith.constant 0.000000e+00 : f32
    %0 = vector.broadcast %cst : f32 to vector<512x32xf32>
    %c0 = arith.constant 0 : index
    %c0_0 = arith.constant 0 : index
    %c0_1 = arith.constant 0 : index
    %c0_2 = arith.constant 0 : index
    %1 = vector.load %arg1[%c0, %c0_0, %c0_1, %c0_2] : memref<2x18x18x4xf32, #tpu.memory_space<vmem>>, vector<2x16x16x4xf32>
    %2 = vector.shape_cast %1 : vector<2x16x16x4xf32> to vector<512x4xf32>
    %c0_3 = arith.constant 0 : index
    %c0_4 = arith.constant 0 : index
    %c0_5 = arith.constant 0 : index
    %3 = vector.load %arg2[%c0_3, %c0_4, %c0_5] : memref<9x4x32xf32, #tpu.memory_space<vmem>>, vector<1x4x32xf32>
    %4 = vector.shape_cast %3 : vector<1x4x32xf32> to vector<4x32xf32>
    %cst_6 = arith.constant dense<0.000000e+00> : vector<512x32xf32>
    %5 = tpu.matmul %2, %4, %cst_6 {dimension_numbers = #tpu.dot_dimension_numbers<[1], [0], [0], [1], [0, 0, 1, 1], [], []>} : vector<512x4xf32>, vector<4x32xf32>, vector<512x32xf32> -> vector<512x32xf32>
    %6 = arith.addf %0, %5 : vector<512x32xf32>
    %c0_7 = arith.constant 0 : index
    %c0_8 = arith.constant 0 : index
    %c1 = arith.constant 1 : index
    %c0_9 = arith.constant 0 : index
    %7 = vector.load %arg1[%c0_7, %c0_8, %c1, %c0_9] : memref<2x18x18x4xf32, #tpu.memory_space<vmem>>, vector<2x16x16x4xf32>
    %8 = vector.shape_cast %7 : vector<2x16x16x4xf32> to vector<512x4xf32>
    %c1_10 = arith.constant 1 : index
    %c0_11 = arith.constant 0 : index
    %c0_12 = arith.constant 0 : index
    %9 = vector.load %arg2[%c1_10, %c0_11, %c0_12] : memref<9x4x32xf32, #tpu.memory_space<vmem>>, vector<1x4x32xf32>
    %10 = vector.shape_cast %9 : vector<1x4x32xf32> to vector<4x32xf32>
    %cst_13 = arith.constant dense<0.000000e+00> : vector<512x32xf32>
    %11 = tpu.matmul %8, %10, %cst_13 {dimension_numbers = #tpu.dot_dimension_numbers<[1], [0], [0], [1], [0, 0, 1, 1], [], []>} : vector<512x4xf32>, vector<4x32xf32>, vector<512x32xf32> -> vector<512x32xf32>
    %12 = arith.addf %6, %11 : vector<512x32xf32>
    %c0_14 = arith.constant 0 : index
    %c0_15 = arith.constant 0 : index
    %c2 = arith.constant 2 : index
    %c0_16 = arith.constant 0 : index
    %13 = vector.load %arg1[%c0_14, %c0_15, %c2, %c0_16] : memref<2x18x18x4xf32, #tpu.memory_space<vmem>>, vector<2x16x16x4xf32>
    %14 = vector.shape_cast %13 : vector<2x16x16x4xf32> to vector<512x4xf32>
    %c2_17 = arith.constant 2 : index
    %c0_18 = arith.constant 0 : index
    %c0_19 = arith.constant 0 : index
    %15 = vector.load %arg2[%c2_17, %c0_18, %c0_19] : memref<9x4x32xf32, #tpu.memory_space<vmem>>, vector<1x4x32xf32>
    %16 = vector.shape_cast %15 : vector<1x4x32xf32> to vector<4x32xf32>
    %cst_20 = arith.constant dense<0.000000e+00> : vector<512x32xf32>
    %17 = tpu.matmul %14, %16, %cst_20 {dimension_numbers = #tpu.dot_dimension_numbers<[1], [0], [0], [1], [0, 0, 1, 1], [], []>} : vector<512x4xf32>, vector<4x32xf32>, vector<512x32xf32> -> vector<512x32xf32>
    %18 = arith.addf %12, %17 : vector<512x32xf32>
    %c0_21 = arith.constant 0 : index
    %c1_22 = arith.constant 1 : index
    %c0_23 = arith.constant 0 : index
    %c0_24 = arith.constant 0 : index
    %19 = vector.load %arg1[%c0_21, %c1_22, %c0_23, %c0_24] : memref<2x18x18x4xf32, #tpu.memory_space<vmem>>, vector<2x16x16x4xf32>
    %20 = vector.shape_cast %19 : vector<2x16x16x4xf32> to vector<512x4xf32>
    %c3 = arith.constant 3 : index
    %c0_25 = arith.constant 0 : index
    %c0_26 = arith.constant 0 : index
    %21 = vector.load %arg2[%c3, %c0_25, %c0_26] : memref<9x4x32xf32, #tpu.memory_space<vmem>>, vector<1x4x32xf32>
    %22 = vector.shape_cast %21 : vector<1x4x32xf32> to vector<4x32xf32>
    %cst_27 = arith.constant dense<0.000000e+00> : vector<512x32xf32>
    %23 = tpu.matmul %20, %22, %cst_27 {dimension_numbers = #tpu.dot_dimension_numbers<[1], [0], [0], [1], [0, 0, 1, 1], [], []>} : vector<512x4xf32>, vector<4x32xf32>, vector<512x32xf32> -> vector<512x32xf32>
    %24 = arith.addf %18, %23 : vector<512x32xf32>
    %c0_28 = arith.constant 0 : index
    %c1_29 = arith.constant 1 : index
    %c1_30 = arith.constant 1 : index
    %c0_31 = arith.constant 0 : index
    %25 = vector.load %arg1[%c0_28, %c1_29, %c1_30, %c0_31] : memref<2x18x18x4xf32, #tpu.memory_space<vmem>>, vector<2x16x16x4xf32>
    %26 = vector.shape_cast %25 : vector<2x16x16x4xf32> to vector<512x4xf32>
    %c4 = arith.constant 4 : index
    %c0_32 = arith.constant 0 : index
    %c0_33 = arith.constant 0 : index
    %27 = vector.load %arg2[%c4, %c0_32, %c0_33] : memref<9x4x32xf32, #tpu.memory_space<vmem>>, vector<1x4x32xf32>
    %28 = vector.shape_cast %27 : vector<1x4x32xf32> to vector<4x32xf32>
    %cst_34 = arith.constant dense<0.000000e+00> : vector<512x32xf32>
    %29 = tpu.matmul %26, %28, %cst_34 {dimension_numbers = #tpu.dot_dimension_numbers<[1], [0], [0], [1], [0, 0, 1, 1], [], []>} : vector<512x4xf32>, vector<4x32xf32>, vector<512x32xf32> -> vector<512x32xf32>
    %30 = arith.addf %24, %29 : vector<512x32xf32>
    %c0_35 = arith.constant 0 : index
    %c1_36 = arith.constant 1 : index
    %c2_37 = arith.constant 2 : index
    %c0_38 = arith.constant 0 : index
    %31 = vector.load %arg1[%c0_35, %c1_36, %c2_37, %c0_38] : memref<2x18x18x4xf32, #tpu.memory_space<vmem>>, vector<2x16x16x4xf32>
    %32 = vector.shape_cast %31 : vector<2x16x16x4xf32> to vector<512x4xf32>
    %c5 = arith.constant 5 : index
    %c0_39 = arith.constant 0 : index
    %c0_40 = arith.constant 0 : index
    %33 = vector.load %arg2[%c5, %c0_39, %c0_40] : memref<9x4x32xf32, #tpu.memory_space<vmem>>, vector<1x4x32xf32>
    %34 = vector.shape_cast %33 : vector<1x4x32xf32> to vector<4x32xf32>
    %cst_41 = arith.constant dense<0.000000e+00> : vector<512x32xf32>
    %35 = tpu.matmul %32, %34, %cst_41 {dimension_numbers = #tpu.dot_dimension_numbers<[1], [0], [0], [1], [0, 0, 1, 1], [], []>} : vector<512x4xf32>, vector<4x32xf32>, vector<512x32xf32> -> vector<512x32xf32>
    %36 = arith.addf %30, %35 : vector<512x32xf32>
    %c0_42 = arith.constant 0 : index
    %c2_43 = arith.constant 2 : index
    %c0_44 = arith.constant 0 : index
    %c0_45 = arith.constant 0 : index
    %37 = vector.load %arg1[%c0_42, %c2_43, %c0_44, %c0_45] : memref<2x18x18x4xf32, #tpu.memory_space<vmem>>, vector<2x16x16x4xf32>
    %38 = vector.shape_cast %37 : vector<2x16x16x4xf32> to vector<512x4xf32>
    %c6 = arith.constant 6 : index
    %c0_46 = arith.constant 0 : index
    %c0_47 = arith.constant 0 : index
    %39 = vector.load %arg2[%c6, %c0_46, %c0_47] : memref<9x4x32xf32, #tpu.memory_space<vmem>>, vector<1x4x32xf32>
    %40 = vector.shape_cast %39 : vector<1x4x32xf32> to vector<4x32xf32>
    %cst_48 = arith.constant dense<0.000000e+00> : vector<512x32xf32>
    %41 = tpu.matmul %38, %40, %cst_48 {dimension_numbers = #tpu.dot_dimension_numbers<[1], [0], [0], [1], [0, 0, 1, 1], [], []>} : vector<512x4xf32>, vector<4x32xf32>, vector<512x32xf32> -> vector<512x32xf32>
    %42 = arith.addf %36, %41 : vector<512x32xf32>
    %c0_49 = arith.constant 0 : index
    %c2_50 = arith.constant 2 : index
    %c1_51 = arith.constant 1 : index
    %c0_52 = arith.constant 0 : index
    %43 = vector.load %arg1[%c0_49, %c2_50, %c1_51, %c0_52] : memref<2x18x18x4xf32, #tpu.memory_space<vmem>>, vector<2x16x16x4xf32>
    %44 = vector.shape_cast %43 : vector<2x16x16x4xf32> to vector<512x4xf32>
    %c7 = arith.constant 7 : index
    %c0_53 = arith.constant 0 : index
    %c0_54 = arith.constant 0 : index
    %45 = vector.load %arg2[%c7, %c0_53, %c0_54] : memref<9x4x32xf32, #tpu.memory_space<vmem>>, vector<1x4x32xf32>
    %46 = vector.shape_cast %45 : vector<1x4x32xf32> to vector<4x32xf32>
    %cst_55 = arith.constant dense<0.000000e+00> : vector<512x32xf32>
    %47 = tpu.matmul %44, %46, %cst_55 {dimension_numbers = #tpu.dot_dimension_numbers<[1], [0], [0], [1], [0, 0, 1, 1], [], []>} : vector<512x4xf32>, vector<4x32xf32>, vector<512x32xf32> -> vector<512x32xf32>
    %48 = arith.addf %42, %47 : vector<512x32xf32>
    %c0_56 = arith.constant 0 : index
    %c2_57 = arith.constant 2 : index
    %c2_58 = arith.constant 2 : index
    %c0_59 = arith.constant 0 : index
    %49 = vector.load %arg1[%c0_56, %c2_57, %c2_58, %c0_59] : memref<2x18x18x4xf32, #tpu.memory_space<vmem>>, vector<2x16x16x4xf32>
    %50 = vector.shape_cast %49 : vector<2x16x16x4xf32> to vector<512x4xf32>
    %c8 = arith.constant 8 : index
    %c0_60 = arith.constant 0 : index
    %c0_61 = arith.constant 0 : index
    %51 = vector.load %arg2[%c8, %c0_60, %c0_61] : memref<9x4x32xf32, #tpu.memory_space<vmem>>, vector<1x4x32xf32>
    %52 = vector.shape_cast %51 : vector<1x4x32xf32> to vector<4x32xf32>
    %cst_62 = arith.constant dense<0.000000e+00> : vector<512x32xf32>
    %53 = tpu.matmul %50, %52, %cst_62 {dimension_numbers = #tpu.dot_dimension_numbers<[1], [0], [0], [1], [0, 0, 1, 1], [], []>} : vector<512x4xf32>, vector<4x32xf32>, vector<512x32xf32> -> vector<512x32xf32>
    %54 = arith.addf %48, %53 : vector<512x32xf32>
    %c0_63 = arith.constant 0 : index
    %c0_64 = arith.constant 0 : index
    %55 = vector.load %arg3[%c0_63, %c0_64] : memref<1x32xf32, #tpu.memory_space<vmem>>, vector<1x32xf32>
    %56 = vector.broadcast %55 : vector<1x32xf32> to vector<512x32xf32>
    %57 = arith.addf %54, %56 : vector<512x32xf32>
    %cst_65 = arith.constant 0.000000e+00 : f32
    %58 = vector.broadcast %cst_65 : f32 to vector<512x32xf32>
    %59 = arith.maximumf %57, %58 : vector<512x32xf32>
    %60 = vector.shape_cast %59 : vector<512x32xf32> to vector<2x16x16x32xf32>
    %c0_66 = arith.constant 0 : index
    %c0_67 = arith.constant 0 : index
    %c0_68 = arith.constant 0 : index
    %c0_69 = arith.constant 0 : index
    %61 = vector.load %arg4[%c0_66, %c0_67, %c0_68, %c0_69] : memref<2x16x16x32xf32, #tpu.memory_space<vmem>>, vector<2x16x16x32xf32>
    tpu.vector_store %arg4[%c0_66, %c0_67, %c0_68, %c0_69], %60 {strides = array<i32>} : memref<2x16x16x32xf32, #tpu.memory_space<vmem>>, vector<2x16x16x32xf32>,
    return
  }
  func.func @transform_0(%arg0: i32) -> (i32, i32, i32, i32) {
    %c0_i32 = arith.constant 0 : i32
    %c0_i32_0 = arith.constant 0 : i32
    %c0_i32_1 = arith.constant 0 : i32
    %c0_i32_2 = arith.constant 0 : i32
    return %arg0, %c0_i32, %c0_i32_0, %c0_i32_1 : i32, i32, i32, i32
  }
  func.func @transform_1(%arg0: i32) -> (i32, i32, i32) {
    %c0_i32 = arith.constant 0 : i32
    %c0_i32_0 = arith.constant 0 : i32
    %c0_i32_1 = arith.constant 0 : i32
    %c0_i32_2 = arith.constant 0 : i32
    return %c0_i32, %c0_i32_0, %c0_i32_1 : i32, i32, i32
  }
  func.func @transform_2(%arg0: i32) -> (i32, i32) {
    %c0_i32 = arith.constant 0 : i32
    %c0_i32_0 = arith.constant 0 : i32
    %c0_i32_1 = arith.constant 0 : i32
    return %c0_i32, %c0_i32_0 : i32, i32
  }
  func.func @transform_3(%arg0: i32) -> (i32, i32, i32, i32) {
    %c0_i32 = arith.constant 0 : i32
    %c0_i32_0 = arith.constant 0 : i32
    %c0_i32_1 = arith.constant 0 : i32
    %c0_i32_2 = arith.constant 0 : i32
    return %arg0, %c0_i32, %c0_i32_0, %c0_i32_1 : i32, i32, i32, i32
  }
}

</mosaic_0001>

<bundles_post_ra>
// kernel: tpu_custom_call.1
= control target key start
LH: loop header
LB: loop body
LE: loop exit
PB: predicated region body
PF: predicated region fallthrough
CT: control target
= control target key end

     0   :  { %vm339_vm0 = vcmask 1043456   ;;  %vm146_vm1 = vcmask 31744   ;;  %s12108_s0 = inlined_call_operand.vmem [shape: f32[2,18,18,4], index: 0, kind: input, shape index: {}]   ;;  %s12109_s1 = inlined_call_operand.vmem [shape: f32[9,4,32], index: 1, kind: input, shape index: {}]   ;;  %s12110_s2 = inlined_call_operand.vmem [shape: f32[1,32], index: 2, kind: input, shape index: {}]   ;;  %s12111_s3 = inlined_call_operand.hbm [shape: f32[2,16,16,32], index: 3, kind: output, shape index: {}]  }
   0x1   :  { %v6496_v0 = vld [vmem:[%s12109_s1 + $0x4] sm:$0xf]  ;;  %v9512_v1 = vld [vmem:[%s12109_s1 + $0x10] sm:$0xf]  ;;  %v6823_v3 = vld [vmem:[%s12108_s0 + $0x19] sm:$0xff] }
   0x2   :  { %v80_v2 = vld [vmem:[%s12108_s0 + $0x1] sm:$0xff]  ;;  %8059 = vmatprep.subr.msk.mxu1 %vm339_vm0, %v6496_v0  ;;  %8451 = vmatprep.subr.msk.mxu0 %vm339_vm0, %v9512_v1  ;;  %v81_v4 = vld [vmem:[%s12108_s0 + $0x9] sm:$0xff]  ;;  %v7017_v7 = vld [vmem:[%s12109_s1 + $0x14] sm:$0xf] }
   0x3   :  { %v79_v5 = vld [vmem:[%s12109_s1] sm:$0xf]  ;;  %8060 = vmatpush3.msk.msra.mxu1 %vm339_vm0, %v6496_v0  ;;  %8061 = vmatprep.mubr.msk.f32.mxu1 %vm146_vm1, %v80_v2  ;;  %v6825_v8 = vld [vmem:[%s12108_s0 + $0x31] sm:$0xff]  ;;  %v6827_v10 = vld [vmem:[%s12108_s0 + $0x49] sm:$0xff] }
   0x4   :  { %v6824_v6 = vld [vmem:[%s12108_s0 + $0x21] sm:$0xff]  ;;  %8452 = vmatpush3.msk.msra.mxu0 %vm339_vm0, %v9512_v1  ;;  %8453 = vmatprep.mubr.msk.f32.mxu0 %vm146_vm1, %v6823_v3  ;;  %v6826_v9 = vld [vmem:[%s12108_s0 + $0x39] sm:$0xff]  ;;  %v6828_v11 = vld [vmem:[%s12108_s0 + $0x51] sm:$0xff] }
   0x5   :  { %8062 = vmatmul.mubr.msk.f32.vlgmr.msra.gmra.mrb[0].mxu1 %vm146_vm1, %v81_v4  ;;  %8157 = vmatprep.subr.msk.mxu1 %vm339_vm0, %v79_v5  ;;  %v6829_v12 = vld [vmem:[%s12108_s0 + $0x61] sm:$0xff]  ;;  %v6830_v13 = vld [vmem:[%s12108_s0 + $0x69] sm:$0xff]  ;;  %v9577_v14 = vld [vmem:[%s12109_s1 + $0x18] sm:$0xf] }
   0x6   :  { %8454 = vmatmul.mubr.msk.f32.vlgmr.msra.gmra.mrb[0].mxu0 %vm146_vm1, %v6824_v6  ;;  %8549 = vmatprep.subr.msk.mxu0 %vm339_vm0, %v7017_v7  ;;  %v6831_v15 = vld [vmem:[%s12108_s0 + $0x79] sm:$0xff]  ;;  %v6832_v16 = vld [vmem:[%s12108_s0 + $0x81] sm:$0xff]  ;;  %v6833_v17 = vld [vmem:[%s12108_s0 + $0x91] sm:$0xff] }
   0x7   :  { %8158 = vmatpush3.msk.msra.mxu1 %vm339_vm0, %v79_v5  ;;  %8550 = vmatpush3.msk.msra.mxu0 %vm339_vm0, %v7017_v7  ;;  %v6834_v18 = vld [vmem:[%s12108_s0 + $0x99] sm:$0xff]  ;;  %v6835_v19 = vld [vmem:[%s12108_s0 + $0xa9] sm:$0xff]  ;;  %v6836_v20 = vld [vmem:[%s12108_s0 + $0xb1] sm:$0xff] }
   0x8   :  { %8064 = vmatprep.mubr.msk.f32.mxu1 %vm146_vm1, %v6823_v3  ;;  %8456 = vmatprep.mubr.msk.f32.mxu0 %vm146_vm1, %v6825_v8  ;;  %v6837_v21 = vld [vmem:[%s12108_s0 + $0xc1] sm:$0xff]  ;;  %v6838_v22 = vld [vmem:[%s12108_s0 + $0xc9] sm:$0xff]  ;;  %v6839_v23 = vld [vmem:[%s12108_s0 + $0xd9] sm:$0xff] }
   0x9   :  { %8065 = vmatmul.mubr.msk.f32.gmra.mrb[2].mxu1 %vm146_vm1, %v6824_v6  ;;  %8647 = vmatprep.subr.msk.mxu0 %vm339_vm0, %v9577_v14  ;;  %v6840_v24 = vld [vmem:[%s12108_s0 + $0xe1] sm:$0xff]  ;;  %v6841_v25 = vld [vmem:[%s12108_s0 + $0xf1] sm:$0xff]  ;;  %v6842_v27 = vld [vmem:[%s12108_s0 + $0xf9] sm:$0xff] }
   0xa   :  { %8457 = vmatmul.mubr.msk.f32.gmra.mrb[2].mxu0 %vm146_vm1, %v6826_v9  ;;  %8067 = vmatprep.mubr.msk.f32.mxu1 %vm146_vm1, %v6825_v8  ;;  %v9637_v26 = vld [vmem:[%s12109_s1 + $0x8] sm:$0xf]  ;;  %v6844_v29 = vld [vmem:[%s12108_s0 + $0x111] sm:$0xff]  ;;  %v6847_v32 = vld [vmem:[%s12108_s0 + $0x139] sm:$0xff] }
   0xb   :  { %8459 = vmatprep.mubr.msk.f32.mxu0 %vm146_vm1, %v6827_v10  ;;  %8255 = vmatprep.subr.msk.mxu1 %vm339_vm0, %v9637_v26  ;;  %v6843_v28 = vld [vmem:[%s12108_s0 + $0x109] sm:$0xff]  ;;  %v6845_v30 = vld [vmem:[%s12108_s0 + $0x121] sm:$0xff]  ;;  %v6849_v34 = vld [vmem:[%s12108_s0 + $0x151] sm:$0xff] }
   0xc   :  { %v6846_v31 = vld [vmem:[%s12108_s0 + $0x129] sm:$0xff]  ;;  %v6848_v33 = vld [vmem:[%s12108_s0 + $0x141] sm:$0xff] }
   0xd   :  { %8068 = vmatmul.mubr.msk.f32.gmra.mrb[4].mxu1 %vm146_vm1, %v6826_v9 }
   0xe   :  { %8460 = vmatmul.mubr.msk.f32.gmra.mrb[4].mxu0 %vm146_vm1, %v6828_v11  ;;  %8070 = vmatprep.mubr.msk.f32.mxu1 %vm146_vm1, %v6827_v10 }
   0xf   :  { %8462 = vmatprep.mubr.msk.f32.mxu0 %vm146_vm1, %v6829_v12 }
  0x11   :  { %8071 = vmatmul.mubr.msk.f32.gmra.mrb[6].mxu1 %vm146_vm1, %v6828_v11 }
  0x12   :  { %8463 = vmatmul.mubr.msk.f32.gmra.mrb[6].mxu0 %vm146_vm1, %v6830_v13  ;;  %8073 = vmatprep.mubr.msk.f32.mxu1 %vm146_vm1, %v6829_v12 }
  0x13   :  { %8465 = vmatprep.mubr.msk.f32.mxu0 %vm146_vm1, %v6831_v15 }
  0x15   :  { %8074 = vmatmul.mubr.msk.f32.gmra.mrb[8].mxu1 %vm146_vm1, %v6830_v13 }
  0x16   :  { %8466 = vmatmul.mubr.msk.f32.gmra.mrb[8].mxu0 %vm146_vm1, %v6832_v16  ;;  %8076 = vmatprep.mubr.msk.f32.mxu1 %vm146_vm1, %v6831_v15 }
  0x17   :  { %8468 = vmatprep.mubr.msk.f32.mxu0 %vm146_vm1, %v6833_v17 }
  0x19   :  { %8077 = vmatmul.mubr.msk.f32.gmra.mrb[10].mxu1 %vm146_vm1, %v6832_v16 }
  0x1a   :  { %8469 = vmatmul.mubr.msk.f32.gmra.mrb[10].mxu0 %vm146_vm1, %v6834_v18  ;;  %8079 = vmatprep.mubr.msk.f32.mxu1 %vm146_vm1, %v6833_v17 }
  0x1b   :  { %8471 = vmatprep.mubr.msk.f32.mxu0 %vm146_vm1, %v6835_v19 }
  0x1d   :  { %8080 = vmatmul.mubr.msk.f32.gmra.mrb[12].mxu1 %vm146_vm1, %v6834_v18 }
  0x1e   :  { %8472 = vmatmul.mubr.msk.f32.gmra.mrb[12].mxu0 %vm146_vm1, %v6836_v20  ;;  %8082 = vmatprep.mubr.msk.f32.mxu1 %vm146_vm1, %v6835_v19 }
  0x1f   :  { %8474 = vmatprep.mubr.msk.f32.mxu0 %vm146_vm1, %v6837_v21 }
  0x21   :  { %8083 = vmatmul.mubr.msk.f32.gmra.mrb[14].mxu1 %vm146_vm1, %v6836_v20 }
  0x22   :  { %8475 = vmatmul.mubr.msk.f32.gmra.mrb[14].mxu0 %vm146_vm1, %v6838_v22  ;;  %8085 = vmatprep.mubr.msk.f32.mxu1 %vm146_vm1, %v6837_v21 }
  0x23   :  { %8477 = vmatprep.mubr.msk.f32.mxu0 %vm146_vm1, %v6839_v23 }
  0x25   :  { %8086 = vmatmul.mubr.msk.f32.gmra.mrb[16].mxu1 %vm146_vm1, %v6838_v22 }
  0x26   :  { %8478 = vmatmul.mubr.msk.f32.gmra.mrb[16].mxu0 %vm146_vm1, %v6840_v24  ;;  %8088 = vmatprep.mubr.msk.f32.mxu1 %vm146_vm1, %v6839_v23 }
  0x27   :  { %8480 = vmatprep.mubr.msk.f32.mxu0 %vm146_vm1, %v6841_v25 }
  0x29   :  { %8089 = vmatmul.mubr.msk.f32.gmra.mrb[18].mxu1 %vm146_vm1, %v6840_v24 }
  0x2a   :  { %8481 = vmatmul.mubr.msk.f32.gmra.mrb[18].mxu0 %vm146_vm1, %v6842_v27  ;;  %8091 = vmatprep.mubr.msk.f32.mxu1 %vm146_vm1, %v6841_v25 }
  0x2b   :  { %8483 = vmatprep.mubr.msk.f32.mxu0 %vm146_vm1, %v6843_v28 }
  0x2d   :  { %8092 = vmatmul.mubr.msk.f32.gmra.mrb[20].mxu1 %vm146_vm1, %v6842_v27 }
  0x2e   :  { %8484 = vmatmul.mubr.msk.f32.gmra.mrb[20].mxu0 %vm146_vm1, %v6844_v29  ;;  %8094 = vmatprep.mubr.msk.f32.mxu1 %vm146_vm1, %v6843_v28 }
  0x2f   :  { %8486 = vmatprep.mubr.msk.f32.mxu0 %vm146_vm1, %v6845_v30 }
  0x31   :  { %8095 = vmatmul.mubr.msk.f32.gmra.mrb[22].mxu1 %vm146_vm1, %v6844_v29 }
  0x32   :  { %8487 = vmatmul.mubr.msk.f32.gmra.mrb[22].mxu0 %vm146_vm1, %v6846_v31  ;;  %8097 = vmatprep.mubr.msk.f32.mxu1 %vm146_vm1, %v6845_v30 }
  0x33   :  { %8489 = vmatprep.mubr.msk.f32.mxu0 %vm146_vm1, %v6847_v32 }
  0x34   :  { %8 = vsyncpa [#allocation3], 0  ;;  %v6850_v35 = vld [vmem:[%s12108_s0 + $0x159] sm:$0xff]  ;;  %v6851_v36 = vld [vmem:[%s12108_s0 + $0x169] sm:$0xff]  ;;  %vm6415_vm2 = vcmask 261120  }
  0x35   :  { %8098 = vmatmul.mubr.msk.f32.gmra.mrb[24].mxu1 %vm146_vm1, %v6846_v31  ;;  %v6852_v37 = vld [vmem:[%s12108_s0 + $0x171] sm:$0xff]  ;;  %v6853_v38 = vld [vmem:[%s12108_s0 + $0x181] sm:$0xff]  ;;  %v6854_v39 = vld [vmem:[%s12108_s0 + $0x189] sm:$0xff] }
  0x36   :  { %8490 = vmatmul.mubr.msk.f32.gmra.mrb[24].mxu0 %vm146_vm1, %v6848_v33  ;;  %8100 = vmatprep.mubr.msk.f32.mxu1 %vm146_vm1, %v6847_v32  ;;  %v112_v40 = vld [vmem:[%s12108_s0 + $0x1b1] sm:$0xff]  ;;  %v9714_v41 = vld [vmem:[%s12108_s0 + $0x1a] sm:$0xff]  ;;  %v9727_v43 = vld [vmem:[%s12108_s0 + $0x22] sm:$0xff] }
  0x37   :  { %8492 = vmatprep.mubr.msk.f32.mxu0 %vm146_vm1, %v6849_v34  ;;  %v113_v42 = vld [vmem:[%s12108_s0 + $0x1b9] sm:$0xff]  ;;  %v114_v44 = vld [vmem:[%s12108_s0 + $0x1c9] sm:$0xff]  ;;  %v115_v46 = vld [vmem:[%s12108_s0 + $0x1d1] sm:$0xff] }
  0x38   :  { %v9735_v45 = vld [vmem:[%s12108_s0 + $0x32] sm:$0xff]  ;;  %v9747_v47 = vld [vmem:[%s12109_s1 + $0x1c] sm:$0xf]  ;;  %v116_v49 = vld [vmem:[%s12108_s0 + $0x1e1] sm:$0xff] }
  0x39   :  { %8101 = vmatmul.mubr.msk.f32.gmra.mrb[26].mxu1 %vm146_vm1, %v6848_v33  ;;  %v9756_v48 = vld [vmem:[%s12108_s0 + $0x3a] sm:$0xff]  ;;  %v9764_v50 = vld [vmem:[%s12108_s0 + $0x4a] sm:$0xff]  ;;  %v9780_v52 = vld [vmem:[%s12108_s0 + $0x52] sm:$0xff] }
  0x3a   :  { %8493 = vmatmul.mubr.msk.f32.gmra.mrb[26].mxu0 %vm146_vm1, %v6850_v35  ;;  %8103 = vmatprep.mubr.msk.f32.mxu1 %vm146_vm1, %v6849_v34  ;;  %v117_v51 = vld [vmem:[%s12108_s0 + $0x1e9] sm:$0xff]  ;;  %v118_v53 = vld [vmem:[%s12108_s0 + $0x1f9] sm:$0xff]  ;;  %v119_v55 = vld [vmem:[%s12108_s0 + $0x201] sm:$0xff] }
  0x3b   :  { %8495 = vmatprep.mubr.msk.f32.mxu0 %vm146_vm1, %v6851_v36  ;;  %v9788_v54 = vld [vmem:[%s12108_s0 + $0x62] sm:$0xff]  ;;  %v9802_v56 = vld [vmem:[%s12108_s0 + $0x6a] sm:$0xff]  ;;  %v9810_v58 = vld [vmem:[%s12108_s0 + $0x7a] sm:$0xff] }
  0x3c   :  { %v120_v57 = vld [vmem:[%s12108_s0 + $0x211] sm:$0xff]  ;;  %v121_v59 = vld [vmem:[%s12108_s0 + $0x219] sm:$0xff]  ;;  %v9824_v60 = vld [vmem:[%s12108_s0 + $0x82] sm:$0xff] }
  0x3d   :  { %8104 = vmatmul.mubr.msk.f32.gmra.mrb[28].mxu1 %vm146_vm1, %v6850_v35  ;;  %v122_v61 = vld [vmem:[%s12108_s0 + $0x229] sm:$0xff]  ;;  %v9832_v62 = vld [vmem:[%s12108_s0 + $0x92] sm:$0xff]  ;;  %v9846_v0 = vld [vmem:[%s12108_s0 + $0x9a] sm:$0xff] }
  0x3e   :  { %8496 = vmatmul.mubr.msk.f32.gmra.mrb[28].mxu0 %vm146_vm1, %v6852_v37  ;;  %8106 = vmatprep.mubr.msk.f32.mxu1 %vm146_vm1, %v6851_v36  ;;  %v123_v63 = vld [vmem:[%s12108_s0 + $0x231] sm:$0xff]  ;;  %v124_v2 = vld [vmem:[%s12108_s0 + $0x241] sm:$0xff]  ;;  %v125_v4 = vld [vmem:[%s12108_s0 + $0x249] sm:$0xff] }
  0x3f   :  { %8498 = vmatprep.mubr.msk.f32.mxu0 %vm146_vm1, %v6853_v38  ;;  %v9854_v3 = vld [vmem:[%s12108_s0 + $0xaa] sm:$0xff]  ;;  %v9868_v5 = vld [vmem:[%s12108_s0 + $0xb2] sm:$0xff]  ;;  %v9876_v7 = vld [vmem:[%s12108_s0 + $0xc2] sm:$0xff] }
  0x40   :  { %v126_v6 = vld [vmem:[%s12108_s0 + $0x259] sm:$0xff]  ;;  %v127_v8 = vld [vmem:[%s12108_s0 + $0x261] sm:$0xff]  ;;  %v9890_v9 = vld [vmem:[%s12108_s0 + $0xca] sm:$0xff] }
  0x41   :  { %8107 = vmatmul.mubr.msk.f32.gmra.mrb[30].mxu1 %vm146_vm1, %v6852_v37  ;;  %v128_v10 = vld [vmem:[%s12108_s0 + $0x271] sm:$0xff]  ;;  %v9898_v11 = vld [vmem:[%s12108_s0 + $0xda] sm:$0xff]  ;;  %v9912_v13 = vld [vmem:[%s12108_s0 + $0xe2] sm:$0xff] }
  0x42   :  { %8499 = vmatmul.mubr.msk.f32.gmra.mrb[30].mxu0 %vm146_vm1, %v6854_v39  ;;  %8109 = vmatprep.mubr.msk.f32.mxu1 %vm146_vm1, %v112_v40  ;;  %v129_v12 = vld [vmem:[%s12108_s0 + $0x279] sm:$0xff]  ;;  %v131_v16 = vld [vmem:[%s12108_s0 + $0x291] sm:$0xff]  ;;  %v132_v18 = vld [vmem:[%s12108_s0 + $0x2a1] sm:$0xff] }
  0x43   :  { %8551 = vmatprep.mubr.msk.f32.mxu0 %vm146_vm1, %v9714_v41  ;;  %v9920_v15 = vld [vmem:[%s12108_s0 + $0xf2] sm:$0xff]  ;;  %v9934_v17 = vld [vmem:[%s12108_s0 + $0xfa] sm:$0xff]  ;;  %v9942_v19 = vld [vmem:[%s12108_s0 + $0x10a] sm:$0xff] }
  0x44   :  { %v133_v20 = vld [vmem:[%s12108_s0 + $0x2a9] sm:$0xff]  ;;  %v9956_v21 = vld [vmem:[%s12108_s0 + $0x112] sm:$0xff]  ;;  %v135_v24 = vld [vmem:[%s12108_s0 + $0x2c1] sm:$0xff] }
  0x45   :  { %8110 = vmatmul.mubr.msk.f32.gmra.mrb[32].mxu1 %vm146_vm1, %v113_v42  ;;  %v134_v22 = vld [vmem:[%s12108_s0 + $0x2b9] sm:$0xff]  ;;  %v9964_v23 = vld [vmem:[%s12108_s0 + $0x122] sm:$0xff]  ;;  %v9978_v25 = vld [vmem:[%s12108_s0 + $0x12a] sm:$0xff] }
  0x46   :  { %8552 = vmatmul.mubr.msk.f32.vlgmr.msra.gmra.mrb[0].mxu0 %vm146_vm1, %v9727_v43  ;;  %8112 = vmatprep.mubr.msk.f32.mxu1 %vm146_vm1, %v114_v44  ;;  %v136_v27 = vld [vmem:[%s12108_s0 + $0x2d1] sm:$0xff]  ;;  %v9986_v28 = vld [vmem:[%s12108_s0 + $0x13a] sm:$0xff]  ;;  %v10000_v30 = vld [vmem:[%s12108_s0 + $0x142] sm:$0xff] }
  0x47   :  { %8648 = vmatpush3.msk.msra.mxu0 %vm339_vm0, %v9577_v14  ;;  %8554 = vmatprep.mubr.msk.f32.mxu0 %vm146_vm1, %v9735_v45  ;;  %v130_v14 = vld [vmem:[%s12108_s0 + $0x289] sm:$0xff]  ;;  %v137_v29 = vld [vmem:[%s12108_s0 + $0x2d9] sm:$0xff]  ;;  %v139_v33 = vld [vmem:[%s12108_s0 + $0x2f1] sm:$0xff] }
  0x48   :  { %8745 = vmatprep.subr.msk.mxu0 %vm339_vm0, %v9747_v47  ;;  %v138_v31 = vld [vmem:[%s12108_s0 + $0x2e9] sm:$0xff]  ;;  %v10008_v32 = vld [vmem:[%s12108_s0 + $0x152] sm:$0xff]  ;;  %v10022_v34 = vld [vmem:[%s12108_s0 + $0x15a] sm:$0xff] }
  0x49   :  { %8113 = vmatmul.mubr.msk.f32.gmra.mrb[34].mxu1 %vm146_vm1, %v115_v46  ;;  %v140_v35 = vld [vmem:[%s12108_s0 + $0x301] sm:$0xff]  ;;  %v10030_v36 = vld [vmem:[%s12108_s0 + $0x16a] sm:$0xff]  ;;  %v10044_v38 = vld [vmem:[%s12108_s0 + $0x172] sm:$0xff] }
  0x4a   :  { %8555 = vmatmul.mubr.msk.f32.gmra.mrb[2].mxu0 %vm146_vm1, %v9756_v48  ;;  %8115 = vmatprep.mubr.msk.f32.mxu1 %vm146_vm1, %v116_v49  ;;  %v141_v37 = vld [vmem:[%s12108_s0 + $0x309] sm:$0xff]  ;;  %12150 = vst [vmem:[#allocation5_spill] sm:$0xff] %v10044_v38  ;;  %v142_v39 = vld [vmem:[%s12108_s0 + $0x319] sm:$0xff]  ;;  %v143_v42 = vld [vmem:[%s12108_s0 + $0x321] sm:$0xff] }
  0x4b   :  { %8557 = vmatprep.mubr.msk.f32.mxu0 %vm146_vm1, %v9764_v50  ;;  %v6983_v40 = vld [vmem:[%s12108_s0 + $0x182] sm:$0xff]  ;;  %v6984_v44 = vld [vmem:[%s12108_s0 + $0x18a] sm:$0xff] }
  0x4c   :  { %v15_v46 = vld [vmem:[%s12108_s0] sm:$0xff]  ;;  %v10069_v49 = vld [vmem:[%s12108_s0 + $0x1ca] sm:$0xff] }
  0x4d   :  { %8116 = vmatmul.mubr.msk.f32.gmra.mrb[36].mxu1 %vm146_vm1, %v117_v51  ;;  %12151 = vst [vmem:[#allocation6_spill] sm:$0xff] %v10069_v49  ;;  %v16_v51 = vld [vmem:[%s12108_s0 + $0x8] sm:$0xff] }
  0x4e   :  { %8558 = vmatmul.mubr.msk.f32.gmra.mrb[4].mxu0 %vm146_vm1, %v9780_v52  ;;  %8118 = vmatprep.mubr.msk.f32.mxu1 %vm146_vm1, %v118_v53  ;;  %v10082_v53 = vld [vmem:[%s12108_s0 + $0x1d2] sm:$0xff] }
  0x4f   :  { %8560 = vmatprep.mubr.msk.f32.mxu0 %vm146_vm1, %v9788_v54  ;;  %12152 = vst [vmem:[#allocation7_spill] sm:$0xff] %v10082_v53 }
  0x51   :  { %8119 = vmatmul.mubr.msk.f32.gmra.mrb[38].mxu1 %vm146_vm1, %v119_v55  ;;  %v17_v55 = vld [vmem:[%s12108_s0 + $0x18] sm:$0xff] }
  0x52   :  { %8561 = vmatmul.mubr.msk.f32.gmra.mrb[6].mxu0 %vm146_vm1, %v9802_v56  ;;  %8121 = vmatprep.mubr.msk.f32.mxu1 %vm146_vm1, %v120_v57  ;;  %v10090_v57 = vld [vmem:[%s12108_s0 + $0x1e2] sm:$0xff] }
  0x53   :  { %8563 = vmatprep.mubr.msk.f32.mxu0 %vm146_vm1, %v9810_v58  ;;  %12153 = vst [vmem:[#allocation8_spill] sm:$0xff] %v10090_v57 }
  0x55   :  { %8122 = vmatmul.mubr.msk.f32.gmra.mrb[40].mxu1 %vm146_vm1, %v121_v59  ;;  %v10096_v59 = vld [vmem:[%s12109_s1 + $0xc] sm:$0xf] }
  0x56   :  { %8564 = vmatmul.mubr.msk.f32.gmra.mrb[8].mxu0 %vm146_vm1, %v9824_v60  ;;  %8124 = vmatprep.mubr.msk.f32.mxu1 %vm146_vm1, %v122_v61  ;;  %v18_v61 = vld [vmem:[%s12108_s0 + $0x20] sm:$0xff] }
  0x57   :  { %8566 = vmatprep.mubr.msk.f32.mxu0 %vm146_vm1, %v9832_v62 }
  0x59   :  { %8125 = vmatmul.mubr.msk.f32.gmra.mrb[42].mxu1 %vm146_vm1, %v123_v63  ;;  %v10111_v63 = vld [vmem:[%s12108_s0 + $0x1ea] sm:$0xff] }
  0x5a   :  { %8567 = vmatmul.mubr.msk.f32.gmra.mrb[10].mxu0 %vm146_vm1, %v9846_v0  ;;  %8127 = vmatprep.mubr.msk.f32.mxu1 %vm146_vm1, %v124_v2  ;;  %12154 = vst [vmem:[#allocation9_spill] sm:$0xff] %v10111_v63  ;;  %v10116_v2 = vld [vmem:[%s12108_s0 + $0x30] sm:$0xff] }
  0x5b   :  { %8569 = vmatprep.mubr.msk.f32.mxu0 %vm146_vm1, %v9854_v3 }
  0x5d   :  { %8128 = vmatmul.mubr.msk.f32.gmra.mrb[44].mxu1 %vm146_vm1, %v125_v4  ;;  %v10133_v4 = vld [vmem:[%s12108_s0 + $0x38] sm:$0xff] }
  0x5e   :  { %8570 = vmatmul.mubr.msk.f32.gmra.mrb[12].mxu0 %vm146_vm1, %v9868_v5  ;;  %8130 = vmatprep.mubr.msk.f32.mxu1 %vm146_vm1, %v126_v6  ;;  %v10140_v6 = vld [vmem:[%s12108_s0 + $0x202] sm:$0xff] }
  0x5f   :  { %8572 = vmatprep.mubr.msk.f32.mxu0 %vm146_vm1, %v9876_v7  ;;  %12156 = vst [vmem:[#allocation11_spill] sm:$0xff] %v10140_v6 }
  0x61   :  { %8131 = vmatmul.mubr.msk.f32.gmra.mrb[46].mxu1 %vm146_vm1, %v127_v8  ;;  %v10145_v8 = vld [vmem:[%s12108_s0 + $0x48] sm:$0xff] }
  0x62   :  { %8573 = vmatmul.mubr.msk.f32.gmra.mrb[14].mxu0 %vm146_vm1, %v9890_v9  ;;  %8133 = vmatprep.mubr.msk.f32.mxu1 %vm146_vm1, %v128_v10  ;;  %v10150_v10 = vld [vmem:[%s12108_s0 + $0x212] sm:$0xff] }
  0x63   :  { %8575 = vmatprep.mubr.msk.f32.mxu0 %vm146_vm1, %v9898_v11  ;;  %12157 = vst [vmem:[#allocation12_spill] sm:$0xff] %v10150_v10 }
  0x65   :  { %8134 = vmatmul.mubr.msk.f32.gmra.mrb[48].mxu1 %vm146_vm1, %v129_v12  ;;  %v10161_v12 = vld [vmem:[%s12108_s0 + $0x50] sm:$0xff] }
  0x66   :  { %8576 = vmatmul.mubr.msk.f32.gmra.mrb[16].mxu0 %vm146_vm1, %v9912_v13  ;;  %8136 = vmatprep.mubr.msk.f32.mxu1 %vm146_vm1, %v130_v14  ;;  %v10168_v14 = vld [vmem:[%s12108_s0 + $0x21a] sm:$0xff] }
  0x67   :  { %8578 = vmatprep.mubr.msk.f32.mxu0 %vm146_vm1, %v9920_v15  ;;  %12158 = vst [vmem:[#allocation13_spill] sm:$0xff] %v10168_v14 }
  0x69   :  { %8137 = vmatmul.mubr.msk.f32.gmra.mrb[50].mxu1 %vm146_vm1, %v131_v16  ;;  %v10173_v16 = vld [vmem:[%s12108_s0 + $0x60] sm:$0xff] }
  0x6a   :  { %8579 = vmatmul.mubr.msk.f32.gmra.mrb[18].mxu0 %vm146_vm1, %v9934_v17  ;;  %8139 = vmatprep.mubr.msk.f32.mxu1 %vm146_vm1, %v132_v18  ;;  %v10178_v18 = vld [vmem:[%s12108_s0 + $0x22a] sm:$0xff] }
  0x6b   :  { %8581 = vmatprep.mubr.msk.f32.mxu0 %vm146_vm1, %v9942_v19  ;;  %12159 = vst [vmem:[#allocation14_spill] sm:$0xff] %v10178_v18 }
  0x6d   :  { %8140 = vmatmul.mubr.msk.f32.gmra.mrb[52].mxu1 %vm146_vm1, %v133_v20  ;;  %v10189_v20 = vld [vmem:[%s12108_s0 + $0x68] sm:$0xff] }
  0x6e   :  { %8582 = vmatmul.mubr.msk.f32.gmra.mrb[20].mxu0 %vm146_vm1, %v9956_v21  ;;  %8142 = vmatprep.mubr.msk.f32.mxu1 %vm146_vm1, %v134_v22  ;;  %v10196_v22 = vld [vmem:[%s12108_s0 + $0x232] sm:$0xff] }
  0x6f   :  { %8584 = vmatprep.mubr.msk.f32.mxu0 %vm146_vm1, %v9964_v23  ;;  %12160 = vst [vmem:[#allocation15_spill] sm:$0xff] %v10196_v22 }
  0x71   :  { %8143 = vmatmul.mubr.msk.f32.gmra.mrb[54].mxu1 %vm146_vm1, %v135_v24  ;;  %v10201_v24 = vld [vmem:[%s12108_s0 + $0x78] sm:$0xff] }
  0x72   :  { %8585 = vmatmul.mubr.msk.f32.gmra.mrb[22].mxu0 %vm146_vm1, %v9978_v25  ;;  %8145 = vmatprep.mubr.msk.f32.mxu1 %vm146_vm1, %v136_v27  ;;  %v10206_v27 = vld [vmem:[%s12108_s0 + $0x242] sm:$0xff] }
  0x73   :  { %8587 = vmatprep.mubr.msk.f32.mxu0 %vm146_vm1, %v9986_v28  ;;  %12161 = vst [vmem:[#allocation16_spill] sm:$0xff] %v10206_v27 }
  0x75   :  { %8146 = vmatmul.mubr.msk.f32.gmra.mrb[56].mxu1 %vm146_vm1, %v137_v29  ;;  %v10217_v29 = vld [vmem:[%s12108_s0 + $0x80] sm:$0xff] }
  0x76   :  { %8588 = vmatmul.mubr.msk.f32.gmra.mrb[24].mxu0 %vm146_vm1, %v10000_v30  ;;  %8148 = vmatprep.mubr.msk.f32.mxu1 %vm146_vm1, %v138_v31  ;;  %v10224_v31 = vld [vmem:[%s12108_s0 + $0x24a] sm:$0xff] }
  0x77   :  { %8590 = vmatprep.mubr.msk.f32.mxu0 %vm146_vm1, %v10008_v32  ;;  %12162 = vst [vmem:[#allocation17_spill] sm:$0xff] %v10224_v31 }
  0x79   :  { %8149 = vmatmul.mubr.msk.f32.gmra.mrb[58].mxu1 %vm146_vm1, %v139_v33  ;;  %v10229_v33 = vld [vmem:[%s12108_s0 + $0x90] sm:$0xff] }
  0x7a   :  { %8591 = vmatmul.mubr.msk.f32.gmra.mrb[26].mxu0 %vm146_vm1, %v10022_v34  ;;  %8151 = vmatprep.mubr.msk.f32.mxu1 %vm146_vm1, %v140_v35  ;;  %v10234_v35 = vld [vmem:[%s12108_s0 + $0x25a] sm:$0xff] }
  0x7b   :  { %8593 = vmatprep.mubr.msk.f32.mxu0 %vm146_vm1, %v10030_v36  ;;  %12163 = vst [vmem:[#allocation18_spill] sm:$0xff] %v10234_v35 }
  0x7d   :  { %8152 = vmatmul.mubr.msk.f32.gmra.mrb[60].mxu1 %vm146_vm1, %v141_v37  ;;  %v10245_v37 = vld [vmem:[%s12108_s0 + $0x98] sm:$0xff] }
  0x7e   :  { %8594 = vmatmul.mubr.msk.f32.gmra.mrb[28].mxu0 %vm146_vm1, %v10044_v38  ;;  %8154 = vmatprep.mubr.msk.f32.mxu1 %vm146_vm1, %v142_v39  ;;  %v10252_v39 = vld [vmem:[%s12108_s0 + $0x262] sm:$0xff]  ;;  %v47_v38 = vld [vmem:[%s12108_s0 + $0x1b0] sm:$0xff] }
  0x7f   :  { %8596 = vmatprep.mubr.msk.f32.mxu0 %vm146_vm1, %v6983_v40  ;;  %12164 = vst [vmem:[#allocation19_spill] sm:$0xff] %v10252_v39  ;;  %v10257_v40 = vld [vmem:[%s12108_s0 + $0xa8] sm:$0xff] }
  0x81   :  { %8155 = vmatmul.mubr.msk.f32.gmra.mrb[62].mxu1 %vm146_vm1, %v143_v42  ;;  %v10262_v42 = vld [vmem:[%s12108_s0 + $0x272] sm:$0xff] }
  0x82   :  { %8597 = vmatmul.mubr.msk.f32.gmra.mrb[30].mxu0 %vm146_vm1, %v6984_v44  ;;  %8159 = vmatprep.mubr.msk.f32.mxu1 %vm146_vm1, %v15_v46  ;;  %12165 = vst [vmem:[#allocation20_spill] sm:$0xff] %v10262_v42  ;;  %v10273_v44 = vld [vmem:[%s12108_s0 + $0xb0] sm:$0xff]  ;;  %v10280_v46 = vld [vmem:[%s12108_s0 + $0x27a] sm:$0xff] }
  0x83   :  { %8599 = vmatprep.mubr.msk.f32.mxu0 %vm146_vm1, %v10069_v49  ;;  %12166 = vst [vmem:[#allocation21_spill] sm:$0xff] %v10280_v46  ;;  %v7016_v49 = vld [vmem:[%s12108_s0 + $0x33a] sm:$0xff] }
  0x85   :  { %8160 = vmatmul.mubr.msk.f32.vlgmr.msra.gmra.mrb[0].mxu1 %vm146_vm1, %v16_v51  ;;  %v10285_v51 = vld [vmem:[%s12108_s0 + $0xc0] sm:$0xff] }
  0x86   :  { %8600 = vmatmul.mubr.msk.f32.gmra.mrb[32].mxu0 %vm146_vm1, %v10082_v53  ;;  %8256 = vmatpush3.msk.msra.mxu1 %vm339_vm0, %v9637_v26  ;;  %v10121_v26 = vld [vmem:[%s12108_s0 + $0x1fa] sm:$0xff]  ;;  %v7015_v53 = vld [vmem:[%s12108_s0 + $0x332] sm:$0xff] }
  0x87   :  { %8162 = vmatprep.mubr.msk.f32.mxu1 %vm146_vm1, %v17_v55  ;;  %8602 = vmatprep.mubr.msk.f32.mxu0 %vm146_vm1, %v10090_v57  ;;  %12155 = vst [vmem:[#allocation10_spill] sm:$0xff] %v10121_v26  ;;  %v10290_v55 = vld [vmem:[%s12108_s0 + $0x28a] sm:$0xff]  ;;  %v10476_v57 = vld [vmem:[%s12108_s0 + $0x322] sm:$0xff] }
  0x88   :  { %8353 = vmatprep.subr.msk.mxu1 %vm339_vm0, %v10096_v59  ;;  %12167 = vst [vmem:[#allocation22_spill] sm:$0xff] %v10290_v55  ;;  %12180 = vst [vmem:[#allocation35_spill] sm:$0xff] %v10476_v57 }
  0x89   :  { %8163 = vmatmul.mubr.msk.f32.gmra.mrb[2].mxu1 %vm146_vm1, %v18_v61  ;;  %v10301_v61 = vld [vmem:[%s12108_s0 + $0xc8] sm:$0xff] }
  0x8a   :  { %8603 = vmatmul.mubr.msk.f32.gmra.mrb[34].mxu0 %vm146_vm1, %v10111_v63  ;;  %8165 = vmatprep.mubr.msk.f32.mxu1 %vm146_vm1, %v10116_v2  ;;  %v10458_v63 = vld [vmem:[%s12108_s0 + $0x31a] sm:$0xff] }
  0x8b   :  { %8605 = vmatprep.mubr.msk.f32.mxu0 %vm146_vm1, %v10121_v26  ;;  %v10448_v26 = vld [vmem:[%s12108_s0 + $0x30a] sm:$0xff]  ;;  %12179 = vst [vmem:[#allocation34_spill] sm:$0xff] %v10458_v63 }
  0x8c   :  { %12178 = vst [vmem:[#allocation33_spill] sm:$0xff] %v10448_v26 }
  0x8d   :  { %8166 = vmatmul.mubr.msk.f32.gmra.mrb[4].mxu1 %vm146_vm1, %v10133_v4 }
  0x8e   :  { %8606 = vmatmul.mubr.msk.f32.gmra.mrb[36].mxu0 %vm146_vm1, %v10140_v6  ;;  %8168 = vmatprep.mubr.msk.f32.mxu1 %vm146_vm1, %v10145_v8  ;;  %v10430_v6 = vld [vmem:[%s12108_s0 + $0x302] sm:$0xff] }
  0x8f   :  { %8608 = vmatprep.mubr.msk.f32.mxu0 %vm146_vm1, %v10150_v10  ;;  %v10420_v10 = vld [vmem:[%s12108_s0 + $0x2f2] sm:$0xff]  ;;  %12177 = vst [vmem:[#allocation32_spill] sm:$0xff] %v10430_v6 }
  0x90   :  { %12176 = vst [vmem:[#allocation31_spill] sm:$0xff] %v10420_v10 }
  0x91   :  { %8169 = vmatmul.mubr.msk.f32.gmra.mrb[6].mxu1 %vm146_vm1, %v10161_v12 }
  0x92   :  { %8609 = vmatmul.mubr.msk.f32.gmra.mrb[38].mxu0 %vm146_vm1, %v10168_v14  ;;  %8171 = vmatprep.mubr.msk.f32.mxu1 %vm146_vm1, %v10173_v16  ;;  %v10402_v14 = vld [vmem:[%s12108_s0 + $0x2ea] sm:$0xff] }
  0x93   :  { %8611 = vmatprep.mubr.msk.f32.mxu0 %vm146_vm1, %v10178_v18  ;;  %v10392_v18 = vld [vmem:[%s12108_s0 + $0x2da] sm:$0xff]  ;;  %12175 = vst [vmem:[#allocation30_spill] sm:$0xff] %v10402_v14 }
  0x94   :  { %12174 = vst [vmem:[#allocation29_spill] sm:$0xff] %v10392_v18 }
  0x95   :  { %8172 = vmatmul.mubr.msk.f32.gmra.mrb[8].mxu1 %vm146_vm1, %v10189_v20 }
  0x96   :  { %8612 = vmatmul.mubr.msk.f32.gmra.mrb[40].mxu0 %vm146_vm1, %v10196_v22  ;;  %8174 = vmatprep.mubr.msk.f32.mxu1 %vm146_vm1, %v10201_v24  ;;  %v10374_v22 = vld [vmem:[%s12108_s0 + $0x2d2] sm:$0xff] }
  0x97   :  { %8614 = vmatprep.mubr.msk.f32.mxu0 %vm146_vm1, %v10206_v27  ;;  %v10364_v27 = vld [vmem:[%s12108_s0 + $0x2c2] sm:$0xff]  ;;  %12173 = vst [vmem:[#allocation28_spill] sm:$0xff] %v10374_v22 }
  0x98   :  { %12172 = vst [vmem:[#allocation27_spill] sm:$0xff] %v10364_v27 }
  0x99   :  { %8175 = vmatmul.mubr.msk.f32.gmra.mrb[10].mxu1 %vm146_vm1, %v10217_v29 }
  0x9a   :  { %8615 = vmatmul.mubr.msk.f32.gmra.mrb[42].mxu0 %vm146_vm1, %v10224_v31  ;;  %8177 = vmatprep.mubr.msk.f32.mxu1 %vm146_vm1, %v10229_v33  ;;  %v10346_v31 = vld [vmem:[%s12108_s0 + $0x2ba] sm:$0xff] }
  0x9b   :  { %8617 = vmatprep.mubr.msk.f32.mxu0 %vm146_vm1, %v10234_v35  ;;  %v10336_v35 = vld [vmem:[%s12108_s0 + $0x2aa] sm:$0xff]  ;;  %12171 = vst [vmem:[#allocation26_spill] sm:$0xff] %v10346_v31 }
  0x9c   :  { %12170 = vst [vmem:[#allocation25_spill] sm:$0xff] %v10336_v35 }
  0x9d   :  { %8178 = vmatmul.mubr.msk.f32.gmra.mrb[12].mxu1 %vm146_vm1, %v10245_v37 }
  0x9e   :  { %8618 = vmatmul.mubr.msk.f32.gmra.mrb[44].mxu0 %vm146_vm1, %v10252_v39  ;;  %8180 = vmatprep.mubr.msk.f32.mxu1 %vm146_vm1, %v10257_v40  ;;  %v10318_v39 = vld [vmem:[%s12108_s0 + $0x2a2] sm:$0xff] }
  0x9f   :  { %8620 = vmatprep.mubr.msk.f32.mxu0 %vm146_vm1, %v10262_v42  ;;  %v10308_v42 = vld [vmem:[%s12108_s0 + $0x292] sm:$0xff]  ;;  %12169 = vst [vmem:[#allocation24_spill] sm:$0xff] %v10318_v39 }
  0xa0   :  { %12168 = vst [vmem:[#allocation23_spill] sm:$0xff] %v10308_v42 }
  0xa1   :  { %8181 = vmatmul.mubr.msk.f32.gmra.mrb[14].mxu1 %vm146_vm1, %v10273_v44 }
  0xa2   :  { %8621 = vmatmul.mubr.msk.f32.gmra.mrb[46].mxu0 %vm146_vm1, %v10280_v46  ;;  %8183 = vmatprep.mubr.msk.f32.mxu1 %vm146_vm1, %v10285_v51  ;;  %v10313_v46 = vld [vmem:[%s12108_s0 + $0xd8] sm:$0xff] }
  0xa3   :  { %8623 = vmatprep.mubr.msk.f32.mxu0 %vm146_vm1, %v10290_v55  ;;  %v10329_v55 = vld [vmem:[%s12108_s0 + $0xe0] sm:$0xff] }
  0xa5   :  { %8184 = vmatmul.mubr.msk.f32.gmra.mrb[16].mxu1 %vm146_vm1, %v10301_v61 }
  0xa6   :  { %8624 = vmatmul.mubr.msk.f32.gmra.mrb[48].mxu0 %vm146_vm1, %v10308_v42  ;;  %8186 = vmatprep.mubr.msk.f32.mxu1 %vm146_vm1, %v10313_v46  ;;  %v10341_v42 = vld [vmem:[%s12108_s0 + $0xf0] sm:$0xff] }
  0xa7   :  { %8626 = vmatprep.mubr.msk.f32.mxu0 %vm146_vm1, %v10318_v39  ;;  %v10357_v39 = vld [vmem:[%s12108_s0 + $0xf8] sm:$0xff] }
  0xa9   :  { %8187 = vmatmul.mubr.msk.f32.gmra.mrb[18].mxu1 %vm146_vm1, %v10329_v55 }
  0xaa   :  { %8627 = vmatmul.mubr.msk.f32.gmra.mrb[50].mxu0 %vm146_vm1, %v10336_v35  ;;  %8189 = vmatprep.mubr.msk.f32.mxu1 %vm146_vm1, %v10341_v42  ;;  %v10369_v35 = vld [vmem:[%s12108_s0 + $0x108] sm:$0xff] }
  0xab   :  { %8629 = vmatprep.mubr.msk.f32.mxu0 %vm146_vm1, %v10346_v31  ;;  %v10385_v31 = vld [vmem:[%s12108_s0 + $0x110] sm:$0xff] }
  0xad   :  { %8190 = vmatmul.mubr.msk.f32.gmra.mrb[20].mxu1 %vm146_vm1, %v10357_v39 }
  0xae   :  { %8630 = vmatmul.mubr.msk.f32.gmra.mrb[52].mxu0 %vm146_vm1, %v10364_v27  ;;  %8192 = vmatprep.mubr.msk.f32.mxu1 %vm146_vm1, %v10369_v35  ;;  %v10397_v27 = vld [vmem:[%s12108_s0 + $0x120] sm:$0xff] }
  0xaf   :  { %8632 = vmatprep.mubr.msk.f32.mxu0 %vm146_vm1, %v10374_v22  ;;  %v10413_v22 = vld [vmem:[%s12108_s0 + $0x128] sm:$0xff] }
  0xb1   :  { %8193 = vmatmul.mubr.msk.f32.gmra.mrb[22].mxu1 %vm146_vm1, %v10385_v31 }
  0xb2   :  { %8633 = vmatmul.mubr.msk.f32.gmra.mrb[54].mxu0 %vm146_vm1, %v10392_v18  ;;  %8195 = vmatprep.mubr.msk.f32.mxu1 %vm146_vm1, %v10397_v27  ;;  %v10425_v18 = vld [vmem:[%s12108_s0 + $0x138] sm:$0xff] }
  0xb3   :  { %8635 = vmatprep.mubr.msk.f32.mxu0 %vm146_vm1, %v10402_v14  ;;  %v10441_v14 = vld [vmem:[%s12108_s0 + $0x140] sm:$0xff] }
  0xb5   :  { %8196 = vmatmul.mubr.msk.f32.gmra.mrb[24].mxu1 %vm146_vm1, %v10413_v22 }
  0xb6   :  { %8636 = vmatmul.mubr.msk.f32.gmra.mrb[56].mxu0 %vm146_vm1, %v10420_v10  ;;  %8198 = vmatprep.mubr.msk.f32.mxu1 %vm146_vm1, %v10425_v18  ;;  %v10453_v10 = vld [vmem:[%s12108_s0 + $0x150] sm:$0xff] }
  0xb7   :  { %8638 = vmatprep.mubr.msk.f32.mxu0 %vm146_vm1, %v10430_v6  ;;  %v10469_v6 = vld [vmem:[%s12108_s0 + $0x158] sm:$0xff] }
  0xb9   :  { %8199 = vmatmul.mubr.msk.f32.gmra.mrb[26].mxu1 %vm146_vm1, %v10441_v14 }
  0xba   :  { %8639 = vmatmul.mubr.msk.f32.gmra.mrb[58].mxu0 %vm146_vm1, %v10448_v26  ;;  %8201 = vmatprep.mubr.msk.f32.mxu1 %vm146_vm1, %v10453_v10  ;;  %v10481_v26 = vld [vmem:[%s12108_s0 + $0x168] sm:$0xff] }
  0xbb   :  { %8641 = vmatprep.mubr.msk.f32.mxu0 %vm146_vm1, %v10458_v63  ;;  %v10495_v63 = vld [vmem:[%s12108_s0 + $0x170] sm:$0xff] }
  0xbd   :  { %8202 = vmatmul.mubr.msk.f32.gmra.mrb[28].mxu1 %vm146_vm1, %v10469_v6 }
  0xbe   :  { %8642 = vmatmul.mubr.msk.f32.gmra.mrb[60].mxu0 %vm146_vm1, %v10476_v57  ;;  %8204 = vmatprep.mubr.msk.f32.mxu1 %vm146_vm1, %v10481_v26  ;;  %v48_v57 = vld [vmem:[%s12108_s0 + $0x1b8] sm:$0xff] }
  0xbf   :  { %8644 = vmatprep.mubr.msk.f32.mxu0 %vm146_vm1, %v7015_v53  ;;  %v10516_v53 = vld [vmem:[%s12108_s0 + $0x1c8] sm:$0xff] }
  0xc0   :  { %12181 = vst [vmem:[#allocation36_spill] sm:$0xff] %v10516_v53 }
  0xc1   :  { %8205 = vmatmul.mubr.msk.f32.gmra.mrb[30].mxu1 %vm146_vm1, %v10495_v63 }
  0xc2   :  { %8645 = vmatmul.mubr.msk.f32.gmra.mrb[62].mxu0 %vm146_vm1, %v7016_v49  ;;  %8207 = vmatprep.mubr.msk.f32.mxu1 %vm146_vm1, %v47_v38  ;;  %v10526_v38 = vld [vmem:[%s12108_s0 + $0x1d0] sm:$0xff]  ;;  %v10531_v49 = vld [vmem:[%s12109_s1 + $0x20] sm:$0xf] }
  0xc3   :  { %8649 = vmatprep.mubr.msk.f32.mxu0 %vm146_vm1, %v10116_v2  ;;  %12182 = vst [vmem:[#allocation37_spill] sm:$0xff] %v10526_v38  ;;  %v10560_v2 = vld [vmem:[%s12108_s0 + $0x1f8] sm:$0xff] }
  0xc5   :  { %8208 = vmatmul.mubr.msk.f32.gmra.mrb[32].mxu1 %vm146_vm1, %v48_v57  ;;  %v10540_v57 = vld [vmem:[%s12108_s0 + $0x1e0] sm:$0xff] }
  0xc6   :  { %8650 = vmatmul.mubr.msk.f32.vlgmr.msra.gmra.mrb[0].mxu0 %vm146_vm1, %v10133_v4  ;;  %8210 = vmatprep.mubr.msk.f32.mxu1 %vm146_vm1, %v10516_v53  ;;  %v10571_v4 = vld [vmem:[%s12108_s0 + $0x200] sm:$0xff] }
  0xc7   :  { %8746 = vmatpush3.msk.msra.mxu0 %vm339_vm0, %v9747_v47  ;;  %8652 = vmatprep.mubr.msk.f32.mxu0 %vm146_vm1, %v10145_v8  ;;  %v10553_v47 = vld [vmem:[%s12108_s0 + $0x1e8] sm:$0xff]  ;;  %v10578_v8 = vld [vmem:[%s12108_s0 + $0x210] sm:$0xff]  ;;  %v7114_v53 = vld [vmem:[%s12108_s0 + $0x1a0] sm:$0xff] }
  0xc8   :  { %8843 = vmatprep.subr.msk.mxu0 %vm339_vm0, %v10531_v49 }
  0xc9   :  { %8211 = vmatmul.mubr.msk.f32.gmra.mrb[34].mxu1 %vm146_vm1, %v10526_v38  ;;  %v10800_v38 = vld [vmem:[%s12108_s0 + $0x320] sm:$0xff] }
  0xca   :  { %8653 = vmatmul.mubr.msk.f32.gmra.mrb[2].mxu0 %vm146_vm1, %v10161_v12  ;;  %8213 = vmatprep.mubr.msk.f32.mxu1 %vm146_vm1, %v10540_v57  ;;  %v10589_v12 = vld [vmem:[%s12108_s0 + $0x218] sm:$0xff] }
  0xcb   :  { %8655 = vmatprep.mubr.msk.f32.mxu0 %vm146_vm1, %v10173_v16  ;;  %v10596_v16 = vld [vmem:[%s12108_s0 + $0x228] sm:$0xff] }
  0xcd   :  { %8214 = vmatmul.mubr.msk.f32.gmra.mrb[36].mxu1 %vm146_vm1, %v10553_v47 }
  0xce   :  { %8656 = vmatmul.mubr.msk.f32.gmra.mrb[4].mxu0 %vm146_vm1, %v10189_v20  ;;  %8216 = vmatprep.mubr.msk.f32.mxu1 %vm146_vm1, %v10560_v2  ;;  %v10607_v20 = vld [vmem:[%s12108_s0 + $0x230] sm:$0xff] }
  0xcf   :  { %8658 = vmatprep.mubr.msk.f32.mxu0 %vm146_vm1, %v10201_v24  ;;  %v10614_v24 = vld [vmem:[%s12108_s0 + $0x240] sm:$0xff] }
  0xd1   :  { %8217 = vmatmul.mubr.msk.f32.gmra.mrb[38].mxu1 %vm146_vm1, %v10571_v4 }
  0xd2   :  { %8659 = vmatmul.mubr.msk.f32.gmra.mrb[6].mxu0 %vm146_vm1, %v10217_v29  ;;  %8219 = vmatprep.mubr.msk.f32.mxu1 %vm146_vm1, %v10578_v8  ;;  %v10625_v29 = vld [vmem:[%s12108_s0 + $0x248] sm:$0xff] }
  0xd3   :  { %8661 = vmatprep.mubr.msk.f32.mxu0 %vm146_vm1, %v10229_v33  ;;  %v10632_v33 = vld [vmem:[%s12108_s0 + $0x258] sm:$0xff] }
  0xd5   :  { %8220 = vmatmul.mubr.msk.f32.gmra.mrb[40].mxu1 %vm146_vm1, %v10589_v12 }
  0xd6   :  { %8662 = vmatmul.mubr.msk.f32.gmra.mrb[8].mxu0 %vm146_vm1, %v10245_v37  ;;  %8222 = vmatprep.mubr.msk.f32.mxu1 %vm146_vm1, %v10596_v16  ;;  %v10643_v37 = vld [vmem:[%s12108_s0 + $0x260] sm:$0xff] }
  0xd7   :  { %8664 = vmatprep.mubr.msk.f32.mxu0 %vm146_vm1, %v10257_v40  ;;  %v10650_v40 = vld [vmem:[%s12108_s0 + $0x270] sm:$0xff] }
  0xd9   :  { %8223 = vmatmul.mubr.msk.f32.gmra.mrb[42].mxu1 %vm146_vm1, %v10607_v20 }
  0xda   :  { %8665 = vmatmul.mubr.msk.f32.gmra.mrb[10].mxu0 %vm146_vm1, %v10273_v44  ;;  %8225 = vmatprep.mubr.msk.f32.mxu1 %vm146_vm1, %v10614_v24  ;;  %v10661_v44 = vld [vmem:[%s12108_s0 + $0x278] sm:$0xff] }
  0xdb   :  { %8667 = vmatprep.mubr.msk.f32.mxu0 %vm146_vm1, %v10285_v51  ;;  %v10679_v51 = vld [vmem:[%s12108_s0 + $0x290] sm:$0xff] }
  0xdd   :  { %8226 = vmatmul.mubr.msk.f32.gmra.mrb[44].mxu1 %vm146_vm1, %v10625_v29 }
  0xde   :  { %8668 = vmatmul.mubr.msk.f32.gmra.mrb[12].mxu0 %vm146_vm1, %v10301_v61  ;;  %8228 = vmatprep.mubr.msk.f32.mxu1 %vm146_vm1, %v10632_v33  ;;  %v7113_v61 = vld [vmem:[%s12108_s0 + $0x198] sm:$0xff] }
  0xdf   :  { %8670 = vmatprep.mubr.msk.f32.mxu0 %vm146_vm1, %v10313_v46  ;;  %v10668_v46 = vld [vmem:[%s12108_s0 + $0x288] sm:$0xff] }
  0xe1   :  { %8229 = vmatmul.mubr.msk.f32.gmra.mrb[46].mxu1 %vm146_vm1, %v10643_v37 }
  0xe2   :  { %8671 = vmatmul.mubr.msk.f32.gmra.mrb[14].mxu0 %vm146_vm1, %v10329_v55  ;;  %8231 = vmatprep.mubr.msk.f32.mxu1 %vm146_vm1, %v10650_v40  ;;  %v10781_v55 = vld [vmem:[%s12108_s0 + $0x188] sm:$0xff] }
  0xe3   :  { %8673 = vmatprep.mubr.msk.f32.mxu0 %vm146_vm1, %v10341_v42  ;;  %v10686_v42 = vld [vmem:[%s12108_s0 + $0x2a0] sm:$0xff]  ;;  %12184 = vst [vmem:[#allocation39_spill] sm:$0xff] %v10781_v55 }
  0xe5   :  { %8232 = vmatmul.mubr.msk.f32.gmra.mrb[48].mxu1 %vm146_vm1, %v10661_v44 }
  0xe6   :  { %8674 = vmatmul.mubr.msk.f32.gmra.mrb[16].mxu0 %vm146_vm1, %v10357_v39  ;;  %8234 = vmatprep.mubr.msk.f32.mxu1 %vm146_vm1, %v10668_v46  ;;  %v10697_v39 = vld [vmem:[%s12108_s0 + $0x2a8] sm:$0xff] }
  0xe7   :  { %8676 = vmatprep.mubr.msk.f32.mxu0 %vm146_vm1, %v10369_v35  ;;  %v10704_v35 = vld [vmem:[%s12108_s0 + $0x2b8] sm:$0xff] }
  0xe9   :  { %8235 = vmatmul.mubr.msk.f32.gmra.mrb[50].mxu1 %vm146_vm1, %v10679_v51 }
  0xea   :  { %8677 = vmatmul.mubr.msk.f32.gmra.mrb[18].mxu0 %vm146_vm1, %v10385_v31  ;;  %8237 = vmatprep.mubr.msk.f32.mxu1 %vm146_vm1, %v10686_v42  ;;  %v10715_v31 = vld [vmem:[%s12108_s0 + $0x2c0] sm:$0xff] }
  0xeb   :  { %8679 = vmatprep.mubr.msk.f32.mxu0 %vm146_vm1, %v10397_v27  ;;  %v10722_v27 = vld [vmem:[%s12108_s0 + $0x2d0] sm:$0xff] }
  0xed   :  { %8238 = vmatmul.mubr.msk.f32.gmra.mrb[52].mxu1 %vm146_vm1, %v10697_v39 }
  0xee   :  { %8680 = vmatmul.mubr.msk.f32.gmra.mrb[20].mxu0 %vm146_vm1, %v10413_v22  ;;  %8240 = vmatprep.mubr.msk.f32.mxu1 %vm146_vm1, %v10704_v35  ;;  %v10733_v22 = vld [vmem:[%s12108_s0 + $0x2d8] sm:$0xff] }
  0xef   :  { %8682 = vmatprep.mubr.msk.f32.mxu0 %vm146_vm1, %v10425_v18  ;;  %v10740_v18 = vld [vmem:[%s12108_s0 + $0x2e8] sm:$0xff] }
  0xf1   :  { %8241 = vmatmul.mubr.msk.f32.gmra.mrb[54].mxu1 %vm146_vm1, %v10715_v31 }
  0xf2   :  { %8683 = vmatmul.mubr.msk.f32.gmra.mrb[22].mxu0 %vm146_vm1, %v10441_v14  ;;  %8243 = vmatprep.mubr.msk.f32.mxu1 %vm146_vm1, %v10722_v27  ;;  %v10751_v14 = vld [vmem:[%s12108_s0 + $0x2f0] sm:$0xff] }
  0xf3   :  { %8685 = vmatprep.mubr.msk.f32.mxu0 %vm146_vm1, %v10453_v10  ;;  %v10758_v10 = vld [vmem:[%s12108_s0 + $0x300] sm:$0xff] }
  0xf5   :  { %8244 = vmatmul.mubr.msk.f32.gmra.mrb[56].mxu1 %vm146_vm1, %v10733_v22 }
  0xf6   :  { %8686 = vmatmul.mubr.msk.f32.gmra.mrb[24].mxu0 %vm146_vm1, %v10469_v6  ;;  %8246 = vmatprep.mubr.msk.f32.mxu1 %vm146_vm1, %v10740_v18  ;;  %v10763_v6 = vld [vmem:[%s12108_s0 + $0x180] sm:$0xff] }
  0xf7   :  { %8688 = vmatprep.mubr.msk.f32.mxu0 %vm146_vm1, %v10481_v26  ;;  %12183 = vst [vmem:[#allocation38_spill] sm:$0xff] %v10763_v6  ;;  %v10774_v26 = vld [vmem:[%s12108_s0 + $0x308] sm:$0xff] }
  0xf9   :  { %8247 = vmatmul.mubr.msk.f32.gmra.mrb[58].mxu1 %vm146_vm1, %v10751_v14 }
  0xfa   :  { %8689 = vmatmul.mubr.msk.f32.gmra.mrb[26].mxu0 %vm146_vm1, %v10495_v63  ;;  %8249 = vmatprep.mubr.msk.f32.mxu1 %vm146_vm1, %v10758_v10  ;;  %v10786_v63 = vld [vmem:[%s12108_s0 + $0x318] sm:$0xff] }
  0xfb   :  { %8691 = vmatprep.mubr.msk.f32.mxu0 %vm146_vm1, %v10763_v6  ;;  %v1308_v6 = vld [vmem:[%s12108_s0 + $0x2] sm:$0xff] }
  0xfd   :  { %8250 = vmatmul.mubr.msk.f32.gmra.mrb[60].mxu1 %vm146_vm1, %v10774_v26 }
  0xfe   :  { %8692 = vmatmul.mubr.msk.f32.gmra.mrb[28].mxu0 %vm146_vm1, %v10781_v55  ;;  %8252 = vmatprep.mubr.msk.f32.mxu1 %vm146_vm1, %v10786_v63  ;;  %v1309_v55 = vld [vmem:[%s12108_s0 + $0xa] sm:$0xff] }
  0xff   :  { %8694 = vmatprep.mubr.msk.f32.mxu0 %vm146_vm1, %v7113_v61  ;;  %v7228_v61 = vld [vmem:[%s12108_s0 + $0xe1] sm:$0xff] }
 0x101   :  { %8253 = vmatmul.mubr.msk.f32.gmra.mrb[62].mxu1 %vm146_vm1, %v10800_v38 }
 0x102   :  { %8695 = vmatmul.mubr.msk.f32.gmra.mrb[30].mxu0 %vm146_vm1, %v7114_v53  ;;  %8257 = vmatprep.mubr.msk.f32.mxu1 %vm146_vm1, %v1308_v6  ;;  %v7226_v53 = vld [vmem:[%s12108_s0 + $0xc9] sm:$0xff]  ;;  %v12197_v6 = vld [vmem:[#allocation17_spill] sm:$0xff] }
 0x103   :  { %8697 = vmatprep.mubr.msk.f32.mxu0 %vm146_vm1, %v10540_v57 }
 0x105   :  { %8258 = vmatmul.mubr.msk.f32.vlgmr.msra.gmra.mrb[0].mxu1 %vm146_vm1, %v1309_v55  ;;  %v12198_v55 = vld [vmem:[#allocation18_spill] sm:$0xff] }
 0x106   :  { %8698 = vmatmul.mubr.msk.f32.gmra.mrb[32].mxu0 %vm146_vm1, %v10553_v47  ;;  %8354 = vmatpush3.msk.msra.mxu1 %vm339_vm0, %v10096_v59  ;;  %v12196_v59 = vld [vmem:[#allocation16_spill] sm:$0xff] }
 0x107   :  { %8260 = vmatprep.mubr.msk.f32.mxu1 %vm146_vm1, %v9714_v41  ;;  %8700 = vmatprep.mubr.msk.f32.mxu0 %vm146_vm1, %v10560_v2  ;;  %v10941_v41 = vld [vmem:[%s12108_s0 + $0x338] sm:$0xff] }
 0x108   :  { %8941 = vmatprep.subr.msk.mxu1 %vm339_vm0, %v9512_v1  ;;  %v10928_v1 = vld [vmem:[%s12108_s0 + $0x330] sm:$0xff] }
 0x109   :  { %8261 = vmatmul.mubr.msk.f32.gmra.mrb[2].mxu1 %vm146_vm1, %v9727_v43  ;;  %v7145_v43 = vld [vmem:[%s12108_s0 + $0x348] sm:$0xff] }
 0x10a   :  { %8701 = vmatmul.mubr.msk.f32.gmra.mrb[34].mxu0 %vm146_vm1, %v10571_v4  ;;  %8263 = vmatprep.mubr.msk.f32.mxu1 %vm146_vm1, %v9735_v45  ;;  %v7146_v45 = vld [vmem:[%s12108_s0 + $0x350] sm:$0xff] }
 0x10b   :  { %8703 = vmatprep.mubr.msk.f32.mxu0 %vm146_vm1, %v10578_v8 }
 0x10d   :  { %8264 = vmatmul.mubr.msk.f32.gmra.mrb[4].mxu1 %vm146_vm1, %v9756_v48  ;;  %v1340_v48 = vld [vmem:[%s12108_s0 + $0x1b2] sm:$0xff] }
 0x10e   :  { %8704 = vmatmul.mubr.msk.f32.gmra.mrb[36].mxu0 %vm146_vm1, %v10589_v12  ;;  %8266 = vmatprep.mubr.msk.f32.mxu1 %vm146_vm1, %v9764_v50  ;;  %v7213_v50 = vld [vmem:[%s12108_s0 + $0x31] sm:$0xff] }
 0x10f   :  { %8706 = vmatprep.mubr.msk.f32.mxu0 %vm146_vm1, %v10596_v16 }
 0x111   :  { %8267 = vmatmul.mubr.msk.f32.gmra.mrb[6].mxu1 %vm146_vm1, %v9780_v52  ;;  %v12185_v52 = vld [vmem:[#allocation5_spill] sm:$0xff] }
 0x112   :  { %8707 = vmatmul.mubr.msk.f32.gmra.mrb[38].mxu0 %vm146_vm1, %v10607_v20  ;;  %8269 = vmatprep.mubr.msk.f32.mxu1 %vm146_vm1, %v9788_v54  ;;  %v1341_v54 = vld [vmem:[%s12108_s0 + $0x1ba] sm:$0xff] }
 0x113   :  { %8709 = vmatprep.mubr.msk.f32.mxu0 %vm146_vm1, %v10614_v24 }
 0x115   :  { %8270 = vmatmul.mubr.msk.f32.gmra.mrb[8].mxu1 %vm146_vm1, %v9802_v56  ;;  %v7214_v56 = vld [vmem:[%s12108_s0 + $0x39] sm:$0xff] }
 0x116   :  { %8710 = vmatmul.mubr.msk.f32.gmra.mrb[40].mxu0 %vm146_vm1, %v10625_v29  ;;  %8272 = vmatprep.mubr.msk.f32.mxu1 %vm146_vm1, %v9810_v58  ;;  %v7215_v58 = vld [vmem:[%s12108_s0 + $0x49] sm:$0xff] }
 0x117   :  { %8712 = vmatprep.mubr.msk.f32.mxu0 %vm146_vm1, %v10632_v33 }
 0x119   :  { %8273 = vmatmul.mubr.msk.f32.gmra.mrb[10].mxu1 %vm146_vm1, %v9824_v60  ;;  %v12186_v60 = vld [vmem:[#allocation6_spill] sm:$0xff] }
 0x11a   :  { %8713 = vmatmul.mubr.msk.f32.gmra.mrb[42].mxu0 %vm146_vm1, %v10643_v37  ;;  %8275 = vmatprep.mubr.msk.f32.mxu1 %vm146_vm1, %v9832_v62  ;;  %v7216_v62 = vld [vmem:[%s12108_s0 + $0x51] sm:$0xff] }
 0x11b   :  { %8715 = vmatprep.mubr.msk.f32.mxu0 %vm146_vm1, %v10650_v40 }
 0x11d   :  { %8276 = vmatmul.mubr.msk.f32.gmra.mrb[12].mxu1 %vm146_vm1, %v9846_v0  ;;  %v7217_v0 = vld [vmem:[%s12108_s0 + $0x61] sm:$0xff] }
 0x11e   :  { %8716 = vmatmul.mubr.msk.f32.gmra.mrb[44].mxu0 %vm146_vm1, %v10661_v44  ;;  %8278 = vmatprep.mubr.msk.f32.mxu1 %vm146_vm1, %v9854_v3  ;;  %v12187_v3 = vld [vmem:[#allocation7_spill] sm:$0xff] }
 0x11f   :  { %8718 = vmatprep.mubr.msk.f32.mxu0 %vm146_vm1, %v10668_v46 }
 0x121   :  { %8279 = vmatmul.mubr.msk.f32.gmra.mrb[14].mxu1 %vm146_vm1, %v9868_v5  ;;  %v12188_v5 = vld [vmem:[#allocation8_spill] sm:$0xff] }
 0x122   :  { %8719 = vmatmul.mubr.msk.f32.gmra.mrb[46].mxu0 %vm146_vm1, %v10679_v51  ;;  %8281 = vmatprep.mubr.msk.f32.mxu1 %vm146_vm1, %v9876_v7  ;;  %v7218_v7 = vld [vmem:[%s12108_s0 + $0x69] sm:$0xff] }
 0x123   :  { %8721 = vmatprep.mubr.msk.f32.mxu0 %vm146_vm1, %v10686_v42 }
 0x125   :  { %8282 = vmatmul.mubr.msk.f32.gmra.mrb[16].mxu1 %vm146_vm1, %v9890_v9  ;;  %v7219_v9 = vld [vmem:[%s12108_s0 + $0x79] sm:$0xff] }
 0x126   :  { %8722 = vmatmul.mubr.msk.f32.gmra.mrb[48].mxu0 %vm146_vm1, %v10697_v39  ;;  %8284 = vmatprep.mubr.msk.f32.mxu1 %vm146_vm1, %v9898_v11  ;;  %v12189_v11 = vld [vmem:[#allocation9_spill] sm:$0xff] }
 0x127   :  { %8724 = vmatprep.mubr.msk.f32.mxu0 %vm146_vm1, %v10704_v35 }
 0x129   :  { %8285 = vmatmul.mubr.msk.f32.gmra.mrb[18].mxu1 %vm146_vm1, %v9912_v13  ;;  %v12190_v13 = vld [vmem:[#allocation10_spill] sm:$0xff] }
 0x12a   :  { %8725 = vmatmul.mubr.msk.f32.gmra.mrb[50].mxu0 %vm146_vm1, %v10715_v31  ;;  %8287 = vmatprep.mubr.msk.f32.mxu1 %vm146_vm1, %v9920_v15  ;;  %v7220_v15 = vld [vmem:[%s12108_s0 + $0x81] sm:$0xff] }
 0x12b   :  { %8727 = vmatprep.mubr.msk.f32.mxu0 %vm146_vm1, %v10722_v27 }
 0x12d   :  { %8288 = vmatmul.mubr.msk.f32.gmra.mrb[20].mxu1 %vm146_vm1, %v9934_v17  ;;  %v7221_v17 = vld [vmem:[%s12108_s0 + $0x91] sm:$0xff] }
 0x12e   :  { %8728 = vmatmul.mubr.msk.f32.gmra.mrb[52].mxu0 %vm146_vm1, %v10733_v22  ;;  %8290 = vmatprep.mubr.msk.f32.mxu1 %vm146_vm1, %v9942_v19  ;;  %v12191_v19 = vld [vmem:[#allocation11_spill] sm:$0xff] }
 0x12f   :  { %8730 = vmatprep.mubr.msk.f32.mxu0 %vm146_vm1, %v10740_v18 }
 0x131   :  { %8291 = vmatmul.mubr.msk.f32.gmra.mrb[22].mxu1 %vm146_vm1, %v9956_v21  ;;  %v12192_v21 = vld [vmem:[#allocation12_spill] sm:$0xff] }
 0x132   :  { %8731 = vmatmul.mubr.msk.f32.gmra.mrb[54].mxu0 %vm146_vm1, %v10751_v14  ;;  %8293 = vmatprep.mubr.msk.f32.mxu1 %vm146_vm1, %v9964_v23  ;;  %v7222_v23 = vld [vmem:[%s12108_s0 + $0x99] sm:$0xff] }
 0x133   :  { %8733 = vmatprep.mubr.msk.f32.mxu0 %vm146_vm1, %v10758_v10 }
 0x135   :  { %8294 = vmatmul.mubr.msk.f32.gmra.mrb[24].mxu1 %vm146_vm1, %v9978_v25  ;;  %v7223_v25 = vld [vmem:[%s12108_s0 + $0xa9] sm:$0xff] }
 0x136   :  { %8734 = vmatmul.mubr.msk.f32.gmra.mrb[56].mxu0 %vm146_vm1, %v10774_v26  ;;  %8296 = vmatprep.mubr.msk.f32.mxu1 %vm146_vm1, %v9986_v28  ;;  %v12193_v28 = vld [vmem:[#allocation13_spill] sm:$0xff] }
 0x137   :  { %8736 = vmatprep.mubr.msk.f32.mxu0 %vm146_vm1, %v10786_v63 }
 0x139   :  { %8297 = vmatmul.mubr.msk.f32.gmra.mrb[26].mxu1 %vm146_vm1, %v10000_v30  ;;  %v12194_v30 = vld [vmem:[#allocation14_spill] sm:$0xff] }
 0x13a   :  { %8737 = vmatmul.mubr.msk.f32.gmra.mrb[58].mxu0 %vm146_vm1, %v10800_v38  ;;  %8299 = vmatprep.mubr.msk.f32.mxu1 %vm146_vm1, %v10008_v32  ;;  %v7224_v32 = vld [vmem:[%s12108_s0 + $0xb1] sm:$0xff] }
 0x13b   :  { %8739 = vmatprep.mubr.msk.f32.mxu0 %vm146_vm1, %v10928_v1 }
 0x13d   :  { %8300 = vmatmul.mubr.msk.f32.gmra.mrb[28].mxu1 %vm146_vm1, %v10022_v34  ;;  %v7225_v34 = vld [vmem:[%s12108_s0 + $0xc1] sm:$0xff] }
 0x13e   :  { %8740 = vmatmul.mubr.msk.f32.gmra.mrb[60].mxu0 %vm146_vm1, %v10941_v41  ;;  %8302 = vmatprep.mubr.msk.f32.mxu1 %vm146_vm1, %v10030_v36  ;;  %v12195_v36 = vld [vmem:[#allocation15_spill] sm:$0xff] }
 0x13f   :  { %8742 = vmatprep.mubr.msk.f32.mxu0 %vm146_vm1, %v7145_v43  ;;  %v7229_v43 = vld [vmem:[%s12108_s0 + $0xf1] sm:$0xff] }
 0x141   :  { %8303 = vmatmul.mubr.msk.f32.gmra.mrb[30].mxu1 %vm146_vm1, %v12185_v52  ;;  %v7231_v52 = vld [vmem:[%s12108_s0 + $0x109] sm:$0xff] }
 0x142   :  { %8743 = vmatmul.mubr.msk.f32.gmra.mrb[62].mxu0 %vm146_vm1, %v7146_v45  ;;  %8305 = vmatprep.mubr.msk.f32.mxu1 %vm146_vm1, %v1340_v48  ;;  %v12199_v45 = vld [vmem:[#allocation19_spill] sm:$0xff]  ;;  %v12200_v48 = vld [vmem:[#allocation20_spill] sm:$0xff] }
 0x143   :  { %8747 = vmatprep.mubr.msk.f32.mxu0 %vm146_vm1, %v7213_v50  ;;  %v7230_v50 = vld [vmem:[%s12108_s0 + $0xf9] sm:$0xff] }
 0x145   :  { %8306 = vmatmul.mubr.msk.f32.gmra.mrb[32].mxu1 %vm146_vm1, %v1341_v54  ;;  %v12201_v54 = vld [vmem:[#allocation21_spill] sm:$0xff] }
 0x146   :  { %8748 = vmatmul.mubr.msk.f32.vlgmr.msra.gmra.mrb[0].mxu0 %vm146_vm1, %v7214_v56  ;;  %8308 = vmatprep.mubr.msk.f32.mxu1 %vm146_vm1, %v12186_v60  ;;  %v12202_v56 = vld [vmem:[#allocation22_spill] sm:$0xff] }
 0x147   :  { %8844 = vmatpush3.msk.msra.mxu0 %vm339_vm0, %v10531_v49  ;;  %8750 = vmatprep.mubr.msk.f32.mxu0 %vm146_vm1, %v7215_v58  ;;  %v7227_v49 = vld [vmem:[%s12108_s0 + $0xd9] sm:$0xff]  ;;  %v7232_v58 = vld [vmem:[%s12108_s0 + $0x111] sm:$0xff]  ;;  %v7233_v60 = vld [vmem:[%s12108_s0 + $0x121] sm:$0xff] }
 0x149   :  { %8309 = vmatmul.mubr.msk.f32.gmra.mrb[34].mxu1 %vm146_vm1, %v12187_v3  ;;  %v7234_v3 = vld [vmem:[%s12108_s0 + $0x129] sm:$0xff] }
 0x14a   :  { %8751 = vmatmul.mubr.msk.f32.gmra.mrb[2].mxu0 %vm146_vm1, %v7216_v62  ;;  %8311 = vmatprep.mubr.msk.f32.mxu1 %vm146_vm1, %v12188_v5  ;;  %v12203_v62 = vld [vmem:[#allocation23_spill] sm:$0xff]  ;;  %v7235_v5 = vld [vmem:[%s12108_s0 + $0x139] sm:$0xff] }
 0x14b   :  { %8753 = vmatprep.mubr.msk.f32.mxu0 %vm146_vm1, %v7217_v0  ;;  %v12204_v0 = vld [vmem:[#allocation24_spill] sm:$0xff] }
 0x14d   :  { %8312 = vmatmul.mubr.msk.f32.gmra.mrb[36].mxu1 %vm146_vm1, %v12189_v11  ;;  %v7236_v11 = vld [vmem:[%s12108_s0 + $0x141] sm:$0xff] }
 0x14e   :  { %8754 = vmatmul.mubr.msk.f32.gmra.mrb[4].mxu0 %vm146_vm1, %v7218_v7  ;;  %8314 = vmatprep.mubr.msk.f32.mxu1 %vm146_vm1, %v12190_v13  ;;  %v12205_v7 = vld [vmem:[#allocation25_spill] sm:$0xff]  ;;  %v7237_v13 = vld [vmem:[%s12108_s0 + $0x151] sm:$0xff] }
 0x14f   :  { %8756 = vmatprep.mubr.msk.f32.mxu0 %vm146_vm1, %v7219_v9  ;;  %v12206_v9 = vld [vmem:[#allocation26_spill] sm:$0xff] }
 0x151   :  { %8315 = vmatmul.mubr.msk.f32.gmra.mrb[38].mxu1 %vm146_vm1, %v12191_v19  ;;  %v7238_v19 = vld [vmem:[%s12108_s0 + $0x159] sm:$0xff] }
 0x152   :  { %8757 = vmatmul.mubr.msk.f32.gmra.mrb[6].mxu0 %vm146_vm1, %v7220_v15  ;;  %8317 = vmatprep.mubr.msk.f32.mxu1 %vm146_vm1, %v12192_v21  ;;  %v12207_v15 = vld [vmem:[#allocation27_spill] sm:$0xff] }
 0x153   :  { %8759 = vmatprep.mubr.msk.f32.mxu0 %vm146_vm1, %v7221_v17  ;;  %v12208_v17 = vld [vmem:[#allocation28_spill] sm:$0xff]  ;;  %v7239_v21 = vld [vmem:[%s12108_s0 + $0x169] sm:$0xff] }
 0x155   :  { %8318 = vmatmul.mubr.msk.f32.gmra.mrb[40].mxu1 %vm146_vm1, %v12193_v28  ;;  %v7240_v28 = vld [vmem:[%s12108_s0 + $0x171] sm:$0xff] }
 0x156   :  { %8760 = vmatmul.mubr.msk.f32.gmra.mrb[8].mxu0 %vm146_vm1, %v7222_v23  ;;  %8320 = vmatprep.mubr.msk.f32.mxu1 %vm146_vm1, %v12194_v30  ;;  %v12209_v23 = vld [vmem:[#allocation29_spill] sm:$0xff] }
 0x157   :  { %8762 = vmatprep.mubr.msk.f32.mxu0 %vm146_vm1, %v7223_v25  ;;  %v12210_v25 = vld [vmem:[#allocation30_spill] sm:$0xff] }
 0x158   :  { %v7241_v30 = vld [vmem:[%s12108_s0 + $0x181] sm:$0xff] }
 0x159   :  { %8321 = vmatmul.mubr.msk.f32.gmra.mrb[42].mxu1 %vm146_vm1, %v12195_v36  ;;  %v7242_v36 = vld [vmem:[%s12108_s0 + $0x189] sm:$0xff] }
 0x15a   :  { %8763 = vmatmul.mubr.msk.f32.gmra.mrb[10].mxu0 %vm146_vm1, %v7224_v32  ;;  %8323 = vmatprep.mubr.msk.f32.mxu1 %vm146_vm1, %v12196_v59  ;;  %v12211_v32 = vld [vmem:[#allocation31_spill] sm:$0xff]  ;;  %v7243_v59 = vld [vmem:[%s12108_s0 + $0x199] sm:$0xff] }
 0x15b   :  { %8765 = vmatprep.mubr.msk.f32.mxu0 %vm146_vm1, %v7225_v34  ;;  %v12212_v34 = vld [vmem:[#allocation32_spill] sm:$0xff] }
 0x15d   :  { %8324 = vmatmul.mubr.msk.f32.gmra.mrb[44].mxu1 %vm146_vm1, %v12197_v6  ;;  %v7244_v6 = vld [vmem:[%s12108_s0 + $0x1a1] sm:$0xff] }
 0x15e   :  { %8766 = vmatmul.mubr.msk.f32.gmra.mrb[12].mxu0 %vm146_vm1, %v7226_v53  ;;  %8326 = vmatprep.mubr.msk.f32.mxu1 %vm146_vm1, %v12198_v55  ;;  %v12213_v53 = vld [vmem:[#allocation33_spill] sm:$0xff]  ;;  %v6693_v55 = vld [vmem:[%s12108_s0 + $0x18] sm:$0xff] }
 0x15f   :  { %8768 = vmatprep.mubr.msk.f32.mxu0 %vm146_vm1, %v7227_v49  ;;  %v12214_v49 = vld [vmem:[#allocation34_spill] sm:$0xff] }
 0x161   :  { %8327 = vmatmul.mubr.msk.f32.gmra.mrb[46].mxu1 %vm146_vm1, %v12199_v45  ;;  %v6694_v45 = vld [vmem:[%s12108_s0 + $0x20] sm:$0xff] }
 0x162   :  { %8769 = vmatmul.mubr.msk.f32.gmra.mrb[14].mxu0 %vm146_vm1, %v7228_v61  ;;  %8329 = vmatprep.mubr.msk.f32.mxu1 %vm146_vm1, %v12200_v48  ;;  %v11160_v61 = vld [vmem:[%s12108_s0 + $0x1e1] sm:$0xff]  ;;  %v11174_v48 = vld [vmem:[%s12108_s0 + $0x1e9] sm:$0xff] }
 0x163   :  { %8771 = vmatprep.mubr.msk.f32.mxu0 %vm146_vm1, %v7229_v43  ;;  %v12215_v43 = vld [vmem:[#allocation35_spill] sm:$0xff] }
 0x165   :  { %8330 = vmatmul.mubr.msk.f32.gmra.mrb[48].mxu1 %vm146_vm1, %v12201_v54  ;;  %v9458_v54 = vld [vmem:[%s12109_s1 + $0x10] sm:$0xf] }
 0x166   :  { %8772 = vmatmul.mubr.msk.f32.gmra.mrb[16].mxu0 %vm146_vm1, %v7230_v50  ;;  %8332 = vmatprep.mubr.msk.f32.mxu1 %vm146_vm1, %v12202_v56  ;;  %v6695_v50 = vld [vmem:[%s12108_s0 + $0x30] sm:$0xff]  ;;  %v6696_v56 = vld [vmem:[%s12108_s0 + $0x38] sm:$0xff] }
 0x167   :  { %8774 = vmatprep.mubr.msk.f32.mxu0 %vm146_vm1, %v7231_v52  ;;  %v11182_v52 = vld [vmem:[%s12108_s0 + $0x1f9] sm:$0xff] }
 0x169   :  { %8333 = vmatmul.mubr.msk.f32.gmra.mrb[50].mxu1 %vm146_vm1, %v12203_v62  ;;  %v11208_v62 = vld [vmem:[%s12108_s0 + $0x211] sm:$0xff] }
 0x16a   :  { %8775 = vmatmul.mubr.msk.f32.gmra.mrb[18].mxu0 %vm146_vm1, %v7232_v58  ;;  %8335 = vmatprep.mubr.msk.f32.mxu1 %vm146_vm1, %v12204_v0  ;;  %v11200_v58 = vld [vmem:[%s12108_s0 + $0x201] sm:$0xff]  ;;  %v6698_v0 = vld [vmem:[%s12108_s0 + $0x50] sm:$0xff] }
 0x16b   :  { %8777 = vmatprep.mubr.msk.f32.mxu0 %vm146_vm1, %v7233_v60  ;;  %v6697_v60 = vld [vmem:[%s12108_s0 + $0x48] sm:$0xff] }
 0x16d   :  { %8336 = vmatmul.mubr.msk.f32.gmra.mrb[52].mxu1 %vm146_vm1, %v12205_v7  ;;  %v11230_v7 = vld [vmem:[%s12108_s0 + $0x229] sm:$0xff] }
 0x16e   :  { %8778 = vmatmul.mubr.msk.f32.gmra.mrb[20].mxu0 %vm146_vm1, %v7234_v3  ;;  %8338 = vmatprep.mubr.msk.f32.mxu1 %vm146_vm1, %v12206_v9  ;;  %v11222_v3 = vld [vmem:[%s12108_s0 + $0x219] sm:$0xff]  ;;  %v6700_v9 = vld [vmem:[%s12108_s0 + $0x68] sm:$0xff] }
 0x16f   :  { %8780 = vmatprep.mubr.msk.f32.mxu0 %vm146_vm1, %v7235_v5  ;;  %v6699_v5 = vld [vmem:[%s12108_s0 + $0x60] sm:$0xff] }
 0x171   :  { %8339 = vmatmul.mubr.msk.f32.gmra.mrb[54].mxu1 %vm146_vm1, %v12207_v15  ;;  %v11252_v15 = vld [vmem:[%s12108_s0 + $0x241] sm:$0xff] }
 0x172   :  { %8781 = vmatmul.mubr.msk.f32.gmra.mrb[22].mxu0 %vm146_vm1, %v7236_v11  ;;  %8341 = vmatprep.mubr.msk.f32.mxu1 %vm146_vm1, %v12208_v17  ;;  %v11244_v11 = vld [vmem:[%s12108_s0 + $0x231] sm:$0xff]  ;;  %v6702_v17 = vld [vmem:[%s12108_s0 + $0x80] sm:$0xff] }
 0x173   :  { %8783 = vmatprep.mubr.msk.f32.mxu0 %vm146_vm1, %v7237_v13  ;;  %v6701_v13 = vld [vmem:[%s12108_s0 + $0x78] sm:$0xff] }
 0x175   :  { %8342 = vmatmul.mubr.msk.f32.gmra.mrb[56].mxu1 %vm146_vm1, %v12209_v23  ;;  %v11274_v23 = vld [vmem:[%s12108_s0 + $0x259] sm:$0xff] }
 0x176   :  { %8784 = vmatmul.mubr.msk.f32.gmra.mrb[24].mxu0 %vm146_vm1, %v7238_v19  ;;  %8344 = vmatprep.mubr.msk.f32.mxu1 %vm146_vm1, %v12210_v25  ;;  %v11266_v19 = vld [vmem:[%s12108_s0 + $0x249] sm:$0xff]  ;;  %v6704_v25 = vld [vmem:[%s12108_s0 + $0x98] sm:$0xff] }
 0x177   :  { %8786 = vmatprep.mubr.msk.f32.mxu0 %vm146_vm1, %v7239_v21  ;;  %v6703_v21 = vld [vmem:[%s12108_s0 + $0x90] sm:$0xff] }
 0x179   :  { %8345 = vmatmul.mubr.msk.f32.gmra.mrb[58].mxu1 %vm146_vm1, %v12211_v32  ;;  %v11296_v32 = vld [vmem:[%s12108_s0 + $0x271] sm:$0xff] }
 0x17a   :  { %8787 = vmatmul.mubr.msk.f32.gmra.mrb[26].mxu0 %vm146_vm1, %v7240_v28  ;;  %8347 = vmatprep.mubr.msk.f32.mxu1 %vm146_vm1, %v12212_v34  ;;  %v11288_v28 = vld [vmem:[%s12108_s0 + $0x261] sm:$0xff]  ;;  %v6706_v34 = vld [vmem:[%s12108_s0 + $0xb0] sm:$0xff] }
 0x17b   :  { %8789 = vmatprep.mubr.msk.f32.mxu0 %vm146_vm1, %v7241_v30  ;;  %v6705_v30 = vld [vmem:[%s12108_s0 + $0xa8] sm:$0xff] }
 0x17d   :  { %8348 = vmatmul.mubr.msk.f32.gmra.mrb[60].mxu1 %vm146_vm1, %v12213_v53  ;;  %v11318_v53 = vld [vmem:[%s12108_s0 + $0x289] sm:$0xff] }
 0x17e   :  { %8790 = vmatmul.mubr.msk.f32.gmra.mrb[28].mxu0 %vm146_vm1, %v7242_v36  ;;  %8350 = vmatprep.mubr.msk.f32.mxu1 %vm146_vm1, %v12214_v49  ;;  %v11310_v36 = vld [vmem:[%s12108_s0 + $0x279] sm:$0xff]  ;;  %v6708_v49 = vld [vmem:[%s12108_s0 + $0xc8] sm:$0xff] }
 0x17f   :  { %8792 = vmatprep.mubr.msk.f32.mxu0 %vm146_vm1, %v7243_v59  ;;  %v6707_v59 = vld [vmem:[%s12108_s0 + $0xc0] sm:$0xff] }
 0x181   :  { %8351 = vmatmul.mubr.msk.f32.gmra.mrb[62].mxu1 %vm146_vm1, %v12215_v43  ;;  %v11340_v43 = vld [vmem:[%s12108_s0 + $0x2a1] sm:$0xff] }
 0x182   :  { %8793 = vmatmul.mubr.msk.f32.gmra.mrb[30].mxu0 %vm146_vm1, %v7244_v6  ;;  %8355 = vmatprep.mubr.msk.f32.mxu1 %vm146_vm1, %v6693_v55  ;;  %v11332_v6 = vld [vmem:[%s12108_s0 + $0x291] sm:$0xff] }
 0x183   :  { %8795 = vmatprep.mubr.msk.f32.mxu0 %vm146_vm1, %v11160_v61  ;;  %v6709_v55 = vld [vmem:[%s12108_s0 + $0xd8] sm:$0xff] }
 0x185   :  { %8356 = vmatmul.mubr.msk.f32.vlgmr.msra.gmra.mrb[0].mxu1 %vm146_vm1, %v6694_v45  ;;  %v6710_v45 = vld [vmem:[%s12108_s0 + $0xe0] sm:$0xff] }
 0x186   :  { %8796 = vmatmul.mubr.msk.f32.gmra.mrb[32].mxu0 %vm146_vm1, %v11174_v48  ;;  %8942 = vmatpush3.msk.msra.mxu1 %vm339_vm0, %v9458_v54  ;;  %v6711_v54 = vld [vmem:[%s12108_s0 + $0xf0] sm:$0xff] }
 0x187   :  { %8358 = vmatprep.mubr.msk.f32.mxu1 %vm146_vm1, %v6695_v50  ;;  %8798 = vmatprep.mubr.msk.f32.mxu0 %vm146_vm1, %v11182_v52  ;;  %v11354_v50 = vld [vmem:[%s12108_s0 + $0x2a9] sm:$0xff] }
 0x189   :  { %8359 = vmatmul.mubr.msk.f32.gmra.mrb[2].mxu1 %vm146_vm1, %v6696_v56  ;;  %v11362_v56 = vld [vmem:[%s12108_s0 + $0x2b9] sm:$0xff] }
 0x18a   :  { %8799 = vmatmul.mubr.msk.f32.gmra.mrb[34].mxu0 %vm146_vm1, %v11200_v58  ;;  %8361 = vmatprep.mubr.msk.f32.mxu1 %vm146_vm1, %v6697_v60  ;;  %v6712_v60 = vld [vmem:[%s12108_s0 + $0xf8] sm:$0xff] }
 0x18b   :  { %8801 = vmatprep.mubr.msk.f32.mxu0 %vm146_vm1, %v11208_v62 }
 0x18d   :  { %8362 = vmatmul.mubr.msk.f32.gmra.mrb[4].mxu1 %vm146_vm1, %v6698_v0  ;;  %v11376_v0 = vld [vmem:[%s12108_s0 + $0x2c1] sm:$0xff] }
 0x18e   :  { %8802 = vmatmul.mubr.msk.f32.gmra.mrb[36].mxu0 %vm146_vm1, %v11222_v3  ;;  %8364 = vmatprep.mubr.msk.f32.mxu1 %vm146_vm1, %v6699_v5  ;;  %v6713_v5 = vld [vmem:[%s12108_s0 + $0x108] sm:$0xff] }
 0x18f   :  { %8804 = vmatprep.mubr.msk.f32.mxu0 %vm146_vm1, %v11230_v7 }
 0x191   :  { %8365 = vmatmul.mubr.msk.f32.gmra.mrb[6].mxu1 %vm146_vm1, %v6700_v9  ;;  %v11384_v9 = vld [vmem:[%s12108_s0 + $0x2d1] sm:$0xff] }
 0x192   :  { %8805 = vmatmul.mubr.msk.f32.gmra.mrb[38].mxu0 %vm146_vm1, %v11244_v11  ;;  %8367 = vmatprep.mubr.msk.f32.mxu1 %vm146_vm1, %v6701_v13  ;;  %v6714_v13 = vld [vmem:[%s12108_s0 + $0x110] sm:$0xff] }
 0x193   :  { %8807 = vmatprep.mubr.msk.f32.mxu0 %vm146_vm1, %v11252_v15 }
 0x195   :  { %8368 = vmatmul.mubr.msk.f32.gmra.mrb[8].mxu1 %vm146_vm1, %v6702_v17  ;;  %v11398_v17 = vld [vmem:[%s12108_s0 + $0x2d9] sm:$0xff] }
 0x196   :  { %8808 = vmatmul.mubr.msk.f32.gmra.mrb[40].mxu0 %vm146_vm1, %v11266_v19  ;;  %8370 = vmatprep.mubr.msk.f32.mxu1 %vm146_vm1, %v6703_v21  ;;  %v6715_v21 = vld [vmem:[%s12108_s0 + $0x120] sm:$0xff] }
 0x197   :  { %8810 = vmatprep.mubr.msk.f32.mxu0 %vm146_vm1, %v11274_v23 }
 0x199   :  { %8371 = vmatmul.mubr.msk.f32.gmra.mrb[10].mxu1 %vm146_vm1, %v6704_v25  ;;  %v11406_v25 = vld [vmem:[%s12108_s0 + $0x2e9] sm:$0xff] }
 0x19a   :  { %8811 = vmatmul.mubr.msk.f32.gmra.mrb[42].mxu0 %vm146_vm1, %v11288_v28  ;;  %8373 = vmatprep.mubr.msk.f32.mxu1 %vm146_vm1, %v6705_v30  ;;  %v6716_v30 = vld [vmem:[%s12108_s0 + $0x128] sm:$0xff] }
 0x19b   :  { %8813 = vmatprep.mubr.msk.f32.mxu0 %vm146_vm1, %v11296_v32 }
 0x19d   :  { %8374 = vmatmul.mubr.msk.f32.gmra.mrb[12].mxu1 %vm146_vm1, %v6706_v34  ;;  %v11420_v34 = vld [vmem:[%s12108_s0 + $0x2f1] sm:$0xff] }
 0x19e   :  { %8814 = vmatmul.mubr.msk.f32.gmra.mrb[44].mxu0 %vm146_vm1, %v11310_v36  ;;  %8376 = vmatprep.mubr.msk.f32.mxu1 %vm146_vm1, %v6707_v59  ;;  %v6717_v59 = vld [vmem:[%s12108_s0 + $0x138] sm:$0xff] }
 0x19f   :  { %8816 = vmatprep.mubr.msk.f32.mxu0 %vm146_vm1, %v11318_v53 }
 0x1a1   :  { %8377 = vmatmul.mubr.msk.f32.gmra.mrb[14].mxu1 %vm146_vm1, %v6708_v49  ;;  %v11428_v49 = vld [vmem:[%s12108_s0 + $0x301] sm:$0xff] }
 0x1a2   :  { %8817 = vmatmul.mubr.msk.f32.gmra.mrb[46].mxu0 %vm146_vm1, %v11332_v6  ;;  %8379 = vmatprep.mubr.msk.f32.mxu1 %vm146_vm1, %v6709_v55  ;;  %v6718_v55 = vld [vmem:[%s12108_s0 + $0x140] sm:$0xff] }
 0x1a3   :  { %8819 = vmatprep.mubr.msk.f32.mxu0 %vm146_vm1, %v11340_v43 }
 0x1a5   :  { %8380 = vmatmul.mubr.msk.f32.gmra.mrb[16].mxu1 %vm146_vm1, %v6710_v45  ;;  %v11442_v45 = vld [vmem:[%s12108_s0 + $0x309] sm:$0xff] }
 0x1a6   :  { %8820 = vmatmul.mubr.msk.f32.gmra.mrb[48].mxu0 %vm146_vm1, %v11354_v50  ;;  %8382 = vmatprep.mubr.msk.f32.mxu1 %vm146_vm1, %v6711_v54  ;;  %v6719_v54 = vld [vmem:[%s12108_s0 + $0x150] sm:$0xff] }
 0x1a7   :  { %8822 = vmatprep.mubr.msk.f32.mxu0 %vm146_vm1, %v11362_v56 }
 0x1a9   :  { %8383 = vmatmul.mubr.msk.f32.gmra.mrb[18].mxu1 %vm146_vm1, %v6712_v60  ;;  %v11450_v60 = vld [vmem:[%s12108_s0 + $0x319] sm:$0xff] }
 0x1aa   :  { %8823 = vmatmul.mubr.msk.f32.gmra.mrb[50].mxu0 %vm146_vm1, %v11376_v0  ;;  %8385 = vmatprep.mubr.msk.f32.mxu1 %vm146_vm1, %v6713_v5  ;;  %v6720_v5 = vld [vmem:[%s12108_s0 + $0x158] sm:$0xff] }
 0x1ab   :  { %8825 = vmatprep.mubr.msk.f32.mxu0 %vm146_vm1, %v11384_v9 }
 0x1ad   :  { %8386 = vmatmul.mubr.msk.f32.gmra.mrb[20].mxu1 %vm146_vm1, %v6714_v13  ;;  %v11464_v13 = vld [vmem:[%s12108_s0 + $0x321] sm:$0xff] }
 0x1ae   :  { %8826 = vmatmul.mubr.msk.f32.gmra.mrb[52].mxu0 %vm146_vm1, %v11398_v17  ;;  %8388 = vmatprep.mubr.msk.f32.mxu1 %vm146_vm1, %v6715_v21  ;;  %12216 = vst [vmem:[#allocation5_spill] sm:$0xff] %v11464_v13  ;;  %v6721_v21 = vld [vmem:[%s12108_s0 + $0x168] sm:$0xff] }
 0x1af   :  { %8828 = vmatprep.mubr.msk.f32.mxu0 %vm146_vm1, %v11406_v25 }
 0x1b1   :  { %8389 = vmatmul.mubr.msk.f32.gmra.mrb[22].mxu1 %vm146_vm1, %v6716_v30  ;;  %v11472_v30 = vld [vmem:[%s12108_s0 + $0x331] sm:$0xff] }
 0x1b2   :  { %8829 = vmatmul.mubr.msk.f32.gmra.mrb[54].mxu0 %vm146_vm1, %v11420_v34  ;;  %8391 = vmatprep.mubr.msk.f32.mxu1 %vm146_vm1, %v6717_v59  ;;  %12217 = vst [vmem:[#allocation6_spill] sm:$0xff] %v11472_v30  ;;  %v6722_v59 = vld [vmem:[%s12108_s0 + $0x170] sm:$0xff] }
 0x1b3   :  { %8831 = vmatprep.mubr.msk.f32.mxu0 %vm146_vm1, %v11428_v49 }
 0x1b5   :  { %8392 = vmatmul.mubr.msk.f32.gmra.mrb[24].mxu1 %vm146_vm1, %v6718_v55  ;;  %v11486_v55 = vld [vmem:[%s12108_s0 + $0x339] sm:$0xff] }
 0x1b6   :  { %8832 = vmatmul.mubr.msk.f32.gmra.mrb[56].mxu0 %vm146_vm1, %v11442_v45  ;;  %8394 = vmatprep.mubr.msk.f32.mxu1 %vm146_vm1, %v6719_v54  ;;  %12218 = vst [vmem:[#allocation7_spill] sm:$0xff] %v11486_v55  ;;  %v7275_v54 = vld [vmem:[%s12108_s0 + $0x349] sm:$0xff] }
 0x1b7   :  { %8834 = vmatprep.mubr.msk.f32.mxu0 %vm146_vm1, %v11450_v60 }
 0x1b9   :  { %8395 = vmatmul.mubr.msk.f32.gmra.mrb[26].mxu1 %vm146_vm1, %v6720_v5  ;;  %v12219_v5 = vld [vmem:[#allocation38_spill] sm:$0xff] }
 0x1ba   :  { %8835 = vmatmul.mubr.msk.f32.gmra.mrb[58].mxu0 %vm146_vm1, %v11464_v13  ;;  %8397 = vmatprep.mubr.msk.f32.mxu1 %vm146_vm1, %v6721_v21  ;;  %v7276_v21 = vld [vmem:[%s12108_s0 + $0x351] sm:$0xff] }
 0x1bb   :  { %8837 = vmatprep.mubr.msk.f32.mxu0 %vm146_vm1, %v11472_v30  ;;  %v7343_v30 = vld [vmem:[%s12108_s0 + $0x32] sm:$0xff] }
 0x1bc   :  { %v12220_v13 = vld [vmem:[#allocation39_spill] sm:$0xff] }
 0x1bd   :  { %8398 = vmatmul.mubr.msk.f32.gmra.mrb[28].mxu1 %vm146_vm1, %v6722_v59  ;;  %v12221_v59 = vld [vmem:[#allocation36_spill] sm:$0xff] }
 0x1be   :  { %8838 = vmatmul.mubr.msk.f32.gmra.mrb[60].mxu0 %vm146_vm1, %v11486_v55  ;;  %8400 = vmatprep.mubr.msk.f32.mxu1 %vm146_vm1, %v12219_v5  ;;  %v7345_v5 = vld [vmem:[%s12108_s0 + $0x4a] sm:$0xff]  ;;  %v12222_v55 = vld [vmem:[#allocation37_spill] sm:$0xff] }
 0x1bf   :  { %8840 = vmatprep.mubr.msk.f32.mxu0 %vm146_vm1, %v7275_v54  ;;  %v7344_v54 = vld [vmem:[%s12108_s0 + $0x3a] sm:$0xff] }
 0x1c1   :  { %8401 = vmatmul.mubr.msk.f32.gmra.mrb[30].mxu1 %vm146_vm1, %v12220_v13  ;;  %v7346_v13 = vld [vmem:[%s12108_s0 + $0x52] sm:$0xff] }
 0x1c2   :  { %8841 = vmatmul.mubr.msk.f32.gmra.mrb[62].mxu0 %vm146_vm1, %v7276_v21  ;;  %8403 = vmatprep.mubr.msk.f32.mxu1 %vm146_vm1, %v12221_v59  ;;  %v7375_v21 = vld [vmem:[%s12108_s0 + $0x1e2] sm:$0xff]  ;;  %v7377_v59 = vld [vmem:[%s12108_s0 + $0x1fa] sm:$0xff] }
 0x1c3   :  { %8845 = vmatprep.mubr.msk.f32.mxu0 %vm146_vm1, %v7343_v30  ;;  %v7347_v30 = vld [vmem:[%s12108_s0 + $0x62] sm:$0xff] }
 0x1c5   :  { %8404 = vmatmul.mubr.msk.f32.gmra.mrb[32].mxu1 %vm146_vm1, %v12222_v55  ;;  %v7349_v55 = vld [vmem:[%s12108_s0 + $0x7a] sm:$0xff] }
 0x1c6   :  { %8846 = vmatmul.mubr.msk.f32.vlgmr.msra.gmra.mrb[0].mxu0 %vm146_vm1, %v7344_v54  ;;  %8406 = vmatprep.mubr.msk.f32.mxu1 %vm146_vm1, %v10540_v57  ;;  %v7348_v57 = vld [vmem:[%s12108_s0 + $0x6a] sm:$0xff]  ;;  %v7379_v54 = vld [vmem:[%s12108_s0 + $0x212] sm:$0xff] }
 0x1c7   :  { %8848 = vmatprep.mubr.msk.f32.mxu0 %vm146_vm1, %v7345_v5  ;;  %v7381_v5 = vld [vmem:[%s12108_s0 + $0x22a] sm:$0xff] }
 0x1c9   :  { %8407 = vmatmul.mubr.msk.f32.gmra.mrb[34].mxu1 %vm146_vm1, %v10553_v47  ;;  %v7350_v47 = vld [vmem:[%s12108_s0 + $0x82] sm:$0xff] }
 0x1ca   :  { %8849 = vmatmul.mubr.msk.f32.gmra.mrb[2].mxu0 %vm146_vm1, %v7346_v13  ;;  %8409 = vmatprep.mubr.msk.f32.mxu1 %vm146_vm1, %v10560_v2  ;;  %v7351_v2 = vld [vmem:[%s12108_s0 + $0x92] sm:$0xff]  ;;  %v12223_v13 = vld [vmem:[#allocation5_spill] sm:$0xff] }
 0x1cb   :  { %8851 = vmatprep.mubr.msk.f32.mxu0 %vm146_vm1, %v7347_v30  ;;  %v12225_v30 = vld [vmem:[#allocation7_spill] sm:$0xff] }
 0x1cd   :  { %8410 = vmatmul.mubr.msk.f32.gmra.mrb[36].mxu1 %vm146_vm1, %v10571_v4  ;;  %v7352_v4 = vld [vmem:[%s12108_s0 + $0x9a] sm:$0xff] }
 0x1ce   :  { %8852 = vmatmul.mubr.msk.f32.gmra.mrb[4].mxu0 %vm146_vm1, %v7348_v57  ;;  %8412 = vmatprep.mubr.msk.f32.mxu1 %vm146_vm1, %v10578_v8  ;;  %v7353_v8 = vld [vmem:[%s12108_s0 + $0xaa] sm:$0xff] }
 0x1cf   :  { %8854 = vmatprep.mubr.msk.f32.mxu0 %vm146_vm1, %v7349_v55 }
 0x1d1   :  { %8413 = vmatmul.mubr.msk.f32.gmra.mrb[38].mxu1 %vm146_vm1, %v10589_v12  ;;  %v7354_v12 = vld [vmem:[%s12108_s0 + $0xb2] sm:$0xff] }
 0x1d2   :  { %8855 = vmatmul.mubr.msk.f32.gmra.mrb[6].mxu0 %vm146_vm1, %v7350_v47  ;;  %8415 = vmatprep.mubr.msk.f32.mxu1 %vm146_vm1, %v10596_v16  ;;  %v7355_v16 = vld [vmem:[%s12108_s0 + $0xc2] sm:$0xff] }
 0x1d3   :  { %8857 = vmatprep.mubr.msk.f32.mxu0 %vm146_vm1, %v7351_v2 }
 0x1d5   :  { %8416 = vmatmul.mubr.msk.f32.gmra.mrb[40].mxu1 %vm146_vm1, %v10607_v20  ;;  %v7356_v20 = vld [vmem:[%s12108_s0 + $0xca] sm:$0xff] }
 0x1d6   :  { %8858 = vmatmul.mubr.msk.f32.gmra.mrb[8].mxu0 %vm146_vm1, %v7352_v4  ;;  %8418 = vmatprep.mubr.msk.f32.mxu1 %vm146_vm1, %v10614_v24  ;;  %v7357_v24 = vld [vmem:[%s12108_s0 + $0xda] sm:$0xff] }
 0x1d7   :  { %8860 = vmatprep.mubr.msk.f32.mxu0 %vm146_vm1, %v7353_v8 }
 0x1d9   :  { %8419 = vmatmul.mubr.msk.f32.gmra.mrb[42].mxu1 %vm146_vm1, %v10625_v29  ;;  %v7358_v29 = vld [vmem:[%s12108_s0 + $0xe2] sm:$0xff] }
 0x1da   :  { %8861 = vmatmul.mubr.msk.f32.gmra.mrb[10].mxu0 %vm146_vm1, %v7354_v12  ;;  %8421 = vmatprep.mubr.msk.f32.mxu1 %vm146_vm1, %v10632_v33  ;;  %v7359_v33 = vld [vmem:[%s12108_s0 + $0xf2] sm:$0xff] }
 0x1db   :  { %8863 = vmatprep.mubr.msk.f32.mxu0 %vm146_vm1, %v7355_v16 }
 0x1dd   :  { %8422 = vmatmul.mubr.msk.f32.gmra.mrb[44].mxu1 %vm146_vm1, %v10643_v37  ;;  %v7360_v37 = vld [vmem:[%s12108_s0 + $0xfa] sm:$0xff] }
 0x1de   :  { %8864 = vmatmul.mubr.msk.f32.gmra.mrb[12].mxu0 %vm146_vm1, %v7356_v20  ;;  %8424 = vmatprep.mubr.msk.f32.mxu1 %vm146_vm1, %v10650_v40  ;;  %v7361_v40 = vld [vmem:[%s12108_s0 + $0x10a] sm:$0xff] }
 0x1df   :  { %8866 = vmatprep.mubr.msk.f32.mxu0 %vm146_vm1, %v7357_v24 }
 0x1e1   :  { %8425 = vmatmul.mubr.msk.f32.gmra.mrb[46].mxu1 %vm146_vm1, %v10661_v44  ;;  %v7362_v44 = vld [vmem:[%s12108_s0 + $0x112] sm:$0xff] }
 0x1e2   :  { %8867 = vmatmul.mubr.msk.f32.gmra.mrb[14].mxu0 %vm146_vm1, %v7358_v29  ;;  %8427 = vmatprep.mubr.msk.f32.mxu1 %vm146_vm1, %v10668_v46  ;;  %v7363_v46 = vld [vmem:[%s12108_s0 + $0x122] sm:$0xff] }
 0x1e3   :  { %8869 = vmatprep.mubr.msk.f32.mxu0 %vm146_vm1, %v7359_v33 }
 0x1e5   :  { %8428 = vmatmul.mubr.msk.f32.gmra.mrb[48].mxu1 %vm146_vm1, %v10679_v51  ;;  %v7364_v51 = vld [vmem:[%s12108_s0 + $0x12a] sm:$0xff] }
 0x1e6   :  { %8870 = vmatmul.mubr.msk.f32.gmra.mrb[16].mxu0 %vm146_vm1, %v7360_v37  ;;  %8430 = vmatprep.mubr.msk.f32.mxu1 %vm146_vm1, %v10686_v42  ;;  %v7365_v42 = vld [vmem:[%s12108_s0 + $0x13a] sm:$0xff] }
 0x1e7   :  { %8872 = vmatprep.mubr.msk.f32.mxu0 %vm146_vm1, %v7361_v40 }
 0x1e9   :  { %8431 = vmatmul.mubr.msk.f32.gmra.mrb[50].mxu1 %vm146_vm1, %v10697_v39  ;;  %v7366_v39 = vld [vmem:[%s12108_s0 + $0x142] sm:$0xff] }
 0x1ea   :  { %8873 = vmatmul.mubr.msk.f32.gmra.mrb[18].mxu0 %vm146_vm1, %v7362_v44  ;;  %8433 = vmatprep.mubr.msk.f32.mxu1 %vm146_vm1, %v10704_v35  ;;  %v7367_v35 = vld [vmem:[%s12108_s0 + $0x152] sm:$0xff] }
 0x1eb   :  { %8875 = vmatprep.mubr.msk.f32.mxu0 %vm146_vm1, %v7363_v46 }
 0x1ed   :  { %8434 = vmatmul.mubr.msk.f32.gmra.mrb[52].mxu1 %vm146_vm1, %v10715_v31  ;;  %v7368_v31 = vld [vmem:[%s12108_s0 + $0x15a] sm:$0xff] }
 0x1ee   :  { %8876 = vmatmul.mubr.msk.f32.gmra.mrb[20].mxu0 %vm146_vm1, %v7364_v51  ;;  %8436 = vmatprep.mubr.msk.f32.mxu1 %vm146_vm1, %v10722_v27  ;;  %v7369_v27 = vld [vmem:[%s12108_s0 + $0x16a] sm:$0xff] }
 0x1ef   :  { %8878 = vmatprep.mubr.msk.f32.mxu0 %vm146_vm1, %v7365_v42 }
 0x1f1   :  { %8437 = vmatmul.mubr.msk.f32.gmra.mrb[54].mxu1 %vm146_vm1, %v10733_v22  ;;  %v7370_v22 = vld [vmem:[%s12108_s0 + $0x172] sm:$0xff] }
 0x1f2   :  { %8879 = vmatmul.mubr.msk.f32.gmra.mrb[22].mxu0 %vm146_vm1, %v7366_v39  ;;  %8439 = vmatprep.mubr.msk.f32.mxu1 %vm146_vm1, %v10740_v18  ;;  %v7371_v18 = vld [vmem:[%s12108_s0 + $0x182] sm:$0xff] }
 0x1f3   :  { %8881 = vmatprep.mubr.msk.f32.mxu0 %vm146_vm1, %v7367_v35 }
 0x1f5   :  { %8440 = vmatmul.mubr.msk.f32.gmra.mrb[56].mxu1 %vm146_vm1, %v10751_v14  ;;  %v7372_v14 = vld [vmem:[%s12108_s0 + $0x18a] sm:$0xff] }
 0x1f6   :  { %8882 = vmatmul.mubr.msk.f32.gmra.mrb[24].mxu0 %vm146_vm1, %v7368_v31  ;;  %8442 = vmatprep.mubr.msk.f32.mxu1 %vm146_vm1, %v10758_v10  ;;  %v7373_v10 = vld [vmem:[%s12108_s0 + $0x19a] sm:$0xff] }
 0x1f7   :  { %8884 = vmatprep.mubr.msk.f32.mxu0 %vm146_vm1, %v7369_v27 }
 0x1f9   :  { %8443 = vmatmul.mubr.msk.f32.gmra.mrb[58].mxu1 %vm146_vm1, %v10774_v26  ;;  %v7374_v26 = vld [vmem:[%s12108_s0 + $0x1a2] sm:$0xff] }
 0x1fa   :  { %8885 = vmatmul.mubr.msk.f32.gmra.mrb[26].mxu0 %vm146_vm1, %v7370_v22  ;;  %8445 = vmatprep.mubr.msk.f32.mxu1 %vm146_vm1, %v10786_v63  ;;  %v6855_v63 = vld [vmem:[%s12108_s0 + $0x1c9] sm:$0xff] }
 0x1fb   :  { %8887 = vmatprep.mubr.msk.f32.mxu0 %vm146_vm1, %v7371_v18 }
 0x1fd   :  { %8446 = vmatmul.mubr.msk.f32.gmra.mrb[60].mxu1 %vm146_vm1, %v10800_v38  ;;  %v6856_v38 = vld [vmem:[%s12108_s0 + $0x1d1] sm:$0xff] }
 0x1fe   :  { %8888 = vmatmul.mubr.msk.f32.gmra.mrb[28].mxu0 %vm146_vm1, %v7372_v14  ;;  %8448 = vmatprep.mubr.msk.f32.mxu1 %vm146_vm1, %v10928_v1  ;;  %v7376_v1 = vld [vmem:[%s12108_s0 + $0x1ea] sm:$0xff] }
 0x1ff   :  { %8890 = vmatprep.mubr.msk.f32.mxu0 %vm146_vm1, %v7373_v10 }
 0x201   :  { %8449 = vmatmul.mubr.msk.f32.gmra.mrb[62].mxu1 %vm146_vm1, %v10941_v41  ;;  %v7378_v41 = vld [vmem:[%s12108_s0 + $0x202] sm:$0xff] }
 0x202   :  { %8891 = vmatmul.mubr.msk.f32.gmra.mrb[30].mxu0 %vm146_vm1, %v7374_v26  ;;  %8501 = vmatprep.mubr.msk.f32.mxu1 %vm146_vm1, %v6855_v63 }
 0x203   :  { %8893 = vmatprep.mubr.msk.f32.mxu0 %vm146_vm1, %v7375_v21 }
 0x205   :  { %8502 = vmatmul.mubr.msk.f32.vlgmr.msra.gmra.mrb[32].mxu1 %vm146_vm1, %v6856_v38 }
 0x206   :  { %8894 = vmatmul.mubr.msk.f32.gmra.mrb[32].mxu0 %vm146_vm1, %v7376_v1  ;;  %8504 = vmatprep.mubr.msk.f32.mxu1 %vm146_vm1, %v11160_v61  ;;  %v7380_v61 = vld [vmem:[%s12108_s0 + $0x21a] sm:$0xff] }
 0x207   :  { %8896 = vmatprep.mubr.msk.f32.mxu0 %vm146_vm1, %v7377_v59 }
 0x209   :  { %8505 = vmatmul.mubr.msk.f32.gmra.mrb[34].mxu1 %vm146_vm1, %v11174_v48  ;;  %v7382_v48 = vld [vmem:[%s12108_s0 + $0x232] sm:$0xff] }
 0x20a   :  { %8897 = vmatmul.mubr.msk.f32.gmra.mrb[34].mxu0 %vm146_vm1, %v7378_v41  ;;  %8507 = vmatprep.mubr.msk.f32.mxu1 %vm146_vm1, %v11182_v52  ;;  %v7383_v52 = vld [vmem:[%s12108_s0 + $0x242] sm:$0xff] }
 0x20b   :  { %8899 = vmatprep.mubr.msk.f32.mxu0 %vm146_vm1, %v7379_v54  ;;  %v11942_v54 = vld [vmem:[%s12110_s2] ss:$0 sm:$0xff]  ;;  %s9483_s2 = smov [#allocation2]  }
 0x20c   :  { %s6485_s27 = sshll.u32 %s9483_s2, 4  ;;  %s6486_s27 = int_to_ptr.vmem [resolvable:$true] %s6485_s27 }
 0x20d   :  { %8508 = vmatmul.mubr.msk.f32.gmra.mrb[36].mxu1 %vm146_vm1, %v11200_v58  ;;  %v7384_v58 = vld [vmem:[%s12108_s0 + $0x24a] sm:$0xff]  ;;  %s9459_s28 = scalar_lea.vmem %s6486_s27, 8192  ;;  %p9464_p1 = scmp.lt.s32.totalorder %s6486_s27, %s6486_s27 }
 0x20e   :  { %8900 = vmatmul.mubr.msk.f32.gmra.mrb[36].mxu0 %vm146_vm1, %v7380_v61  ;;  %8510 = vmatprep.mubr.msk.f32.mxu1 %vm146_vm1, %v11208_v62  ;;  %v7385_v62 = vld [vmem:[%s12108_s0 + $0x25a] sm:$0xff]  ;;  %p9460_p0 = scmp.ne.s32.totalorder %s6486_s27, %s9459_s28  ;;  %p9465_p2 = scmp.lt.s32.totalorder %s9459_s28, %s9459_s28 }
 0x20f   :  { %8902 = vmatprep.mubr.msk.f32.mxu0 %vm146_vm1, %v7381_v5 }
 0x210   :  { %p9466_p3 = por %p9465_p2, %p9464_p1 }
 0x211   :  { %8511 = vmatmul.mubr.msk.f32.gmra.mrb[38].mxu1 %vm146_vm1, %v11222_v3  ;;  %v7386_v3 = vld [vmem:[%s12108_s0 + $0x262] sm:$0xff] }
 0x212   :  { %8903 = vmatmul.mubr.msk.f32.gmra.mrb[38].mxu0 %vm146_vm1, %v7382_v48  ;;  %8513 = vmatprep.mubr.msk.f32.mxu1 %vm146_vm1, %v11230_v7  ;;  %v7387_v7 = vld [vmem:[%s12108_s0 + $0x272] sm:$0xff]  ;;  %p9467_p4 = pnand %p9466_p3, %p9460_p0 }
 0x213   :  { %8905 = vmatprep.mubr.msk.f32.mxu0 %vm146_vm1, %v7383_v52 }
 0x215   :  { %8514 = vmatmul.mubr.msk.f32.gmra.mrb[40].mxu1 %vm146_vm1, %v11244_v11  ;;  %v7388_v11 = vld [vmem:[%s12108_s0 + $0x27a] sm:$0xff] }
 0x216   :  { %8906 = vmatmul.mubr.msk.f32.gmra.mrb[40].mxu0 %vm146_vm1, %v7384_v58  ;;  %8516 = vmatprep.mubr.msk.f32.mxu1 %vm146_vm1, %v11252_v15  ;;  %v7389_v15 = vld [vmem:[%s12108_s0 + $0x28a] sm:$0xff] }
 0x217   :  { %8908 = vmatprep.mubr.msk.f32.mxu0 %vm146_vm1, %v7385_v62 }
 0x219   :  { %8517 = vmatmul.mubr.msk.f32.gmra.mrb[42].mxu1 %vm146_vm1, %v11266_v19  ;;  %v7390_v19 = vld [vmem:[%s12108_s0 + $0x292] sm:$0xff] }
 0x21a   :  { %8909 = vmatmul.mubr.msk.f32.gmra.mrb[42].mxu0 %vm146_vm1, %v7386_v3  ;;  %8519 = vmatprep.mubr.msk.f32.mxu1 %vm146_vm1, %v11274_v23  ;;  %v7391_v23 = vld [vmem:[%s12108_s0 + $0x2a2] sm:$0xff] }
 0x21b   :  { %8911 = vmatprep.mubr.msk.f32.mxu0 %vm146_vm1, %v7387_v7 }
 0x21d   :  { %8520 = vmatmul.mubr.msk.f32.gmra.mrb[44].mxu1 %vm146_vm1, %v11288_v28  ;;  %v7392_v28 = vld [vmem:[%s12108_s0 + $0x2aa] sm:$0xff] }
 0x21e   :  { %8912 = vmatmul.mubr.msk.f32.gmra.mrb[44].mxu0 %vm146_vm1, %v7388_v11  ;;  %8522 = vmatprep.mubr.msk.f32.mxu1 %vm146_vm1, %v11296_v32  ;;  %v7393_v32 = vld [vmem:[%s12108_s0 + $0x2ba] sm:$0xff] }
 0x21f   :  { %8914 = vmatprep.mubr.msk.f32.mxu0 %vm146_vm1, %v7389_v15 }
 0x221   :  { %8523 = vmatmul.mubr.msk.f32.gmra.mrb[46].mxu1 %vm146_vm1, %v11310_v36  ;;  %v7394_v36 = vld [vmem:[%s12108_s0 + $0x2c2] sm:$0xff] }
 0x222   :  { %8915 = vmatmul.mubr.msk.f32.gmra.mrb[46].mxu0 %vm146_vm1, %v7390_v19  ;;  %8525 = vmatprep.mubr.msk.f32.mxu1 %vm146_vm1, %v11318_v53  ;;  %v7395_v53 = vld [vmem:[%s12108_s0 + $0x2d2] sm:$0xff] }
 0x223   :  { %8917 = vmatprep.mubr.msk.f32.mxu0 %vm146_vm1, %v7391_v23 }
 0x225   :  { %8526 = vmatmul.mubr.msk.f32.gmra.mrb[48].mxu1 %vm146_vm1, %v11332_v6  ;;  %v7396_v6 = vld [vmem:[%s12108_s0 + $0x2da] sm:$0xff] }
 0x226   :  { %8918 = vmatmul.mubr.msk.f32.gmra.mrb[48].mxu0 %vm146_vm1, %v7392_v28  ;;  %8528 = vmatprep.mubr.msk.f32.mxu1 %vm146_vm1, %v11340_v43  ;;  %v7397_v43 = vld [vmem:[%s12108_s0 + $0x2ea] sm:$0xff] }
 0x227   :  { %8920 = vmatprep.mubr.msk.f32.mxu0 %vm146_vm1, %v7393_v32 }
 0x229   :  { %8529 = vmatmul.mubr.msk.f32.gmra.mrb[50].mxu1 %vm146_vm1, %v11354_v50  ;;  %v7398_v50 = vld [vmem:[%s12108_s0 + $0x2f2] sm:$0xff] }
 0x22a   :  { %8921 = vmatmul.mubr.msk.f32.gmra.mrb[50].mxu0 %vm146_vm1, %v7394_v36  ;;  %8531 = vmatprep.mubr.msk.f32.mxu1 %vm146_vm1, %v11362_v56  ;;  %v7399_v56 = vld [vmem:[%s12108_s0 + $0x302] sm:$0xff] }
 0x22b   :  { %8923 = vmatprep.mubr.msk.f32.mxu0 %vm146_vm1, %v7395_v53 }
 0x22d   :  { %8532 = vmatmul.mubr.msk.f32.gmra.mrb[52].mxu1 %vm146_vm1, %v11376_v0  ;;  %v7400_v0 = vld [vmem:[%s12108_s0 + $0x30a] sm:$0xff] }
 0x22e   :  { %8924 = vmatmul.mubr.msk.f32.gmra.mrb[52].mxu0 %vm146_vm1, %v7396_v6  ;;  %8534 = vmatprep.mubr.msk.f32.mxu1 %vm146_vm1, %v11384_v9  ;;  %v7401_v9 = vld [vmem:[%s12108_s0 + $0x31a] sm:$0xff] }
 0x22f   :  { %8926 = vmatprep.mubr.msk.f32.mxu0 %vm146_vm1, %v7397_v43 }
 0x231   :  { %8535 = vmatmul.mubr.msk.f32.gmra.mrb[54].mxu1 %vm146_vm1, %v11398_v17  ;;  %v7402_v17 = vld [vmem:[%s12108_s0 + $0x322] sm:$0xff] }
 0x232   :  { %8927 = vmatmul.mubr.msk.f32.gmra.mrb[54].mxu0 %vm146_vm1, %v7398_v50  ;;  %8537 = vmatprep.mubr.msk.f32.mxu1 %vm146_vm1, %v11406_v25  ;;  %v7403_v25 = vld [vmem:[%s12108_s0 + $0x332] sm:$0xff] }
 0x233   :  { %8929 = vmatprep.mubr.msk.f32.mxu0 %vm146_vm1, %v7399_v56 }
 0x235   :  { %8538 = vmatmul.mubr.msk.f32.gmra.mrb[56].mxu1 %vm146_vm1, %v11420_v34  ;;  %v7404_v34 = vld [vmem:[%s12108_s0 + $0x33a] sm:$0xff] }
 0x236   :  { %8930 = vmatmul.mubr.msk.f32.gmra.mrb[56].mxu0 %vm146_vm1, %v7400_v0  ;;  %8540 = vmatprep.mubr.msk.f32.mxu1 %vm146_vm1, %v11428_v49  ;;  %v7405_v49 = vld [vmem:[%s12108_s0 + $0x34a] sm:$0xff] }
 0x237   :  { %8932 = vmatprep.mubr.msk.f32.mxu0 %vm146_vm1, %v7401_v9 }
 0x239   :  { %8541 = vmatmul.mubr.msk.f32.gmra.mrb[58].mxu1 %vm146_vm1, %v11442_v45  ;;  %v12224_v45 = vld [vmem:[#allocation6_spill] sm:$0xff] }
 0x23a   :  { %8933 = vmatmul.mubr.msk.f32.gmra.mrb[58].mxu0 %vm146_vm1, %v7402_v17  ;;  %8543 = vmatprep.mubr.msk.f32.mxu1 %vm146_vm1, %v11450_v60  ;;  %v7406_v60 = vld [vmem:[%s12108_s0 + $0x352] sm:$0xff] }
 0x23b   :  { %8935 = vmatprep.mubr.msk.f32.mxu0 %vm146_vm1, %v7403_v25 }
 0x23d   :  { %8544 = vmatmul.mubr.msk.f32.gmra.mrb[60].mxu1 %vm146_vm1, %v12223_v13 }
 0x23e   :  { %8936 = vmatmul.mubr.msk.f32.gmra.mrb[60].mxu0 %vm146_vm1, %v7404_v34  ;;  %8546 = vmatprep.mubr.msk.f32.mxu1 %vm146_vm1, %v12224_v45 }
 0x23f   :  { %8938 = vmatprep.mubr.msk.f32.mxu0 %vm146_vm1, %v7405_v49 }
 0x241   :  { %8547 = vmatmul.mubr.msk.f32.gmra.mrb[62].mxu1 %vm146_vm1, %v12225_v30 }
 0x242   :  { %8939 = vmatmul.mubr.msk.f32.gmra.mrb[62].mxu0 %vm146_vm1, %v7406_v60 }
 0x258   :  { %v8357_v57 = vpop.f32.mrb[0].mxu1 }
 0x259   :  { %v2346_v55 = vpop.f32.mrb[1].mxu1 }
 0x25c   :  { %v8360_v47 = vpop.f32.mrb[2].mxu1 }
 0x25d   :  { %v2356_v2 = vpop.f32.mrb[3].mxu1 }
 0x260   :  { %v8363_v4 = vpop.f32.mrb[4].mxu1 }
 0x261   :  { %v2366_v8 = vpop.f32.mrb[5].mxu1 }
 0x264   :  { %v8366_v12 = vpop.f32.mrb[6].mxu1 }
 0x265   :  { %v2376_v16 = vpop.f32.mrb[7].mxu1 }
 0x268   :  { %v11891_v20 = vpop.f32.mrb[8].mxu1 }
 0x269   :  { %v11893_v24 = vpop.f32.mrb[9].mxu1 }
 0x26c   :  { %v11895_v29 = vpop.f32.mrb[10].mxu1 }
 0x26d   :  { %v11897_v33 = vpop.f32.mrb[11].mxu1 }
 0x270   :  { %v11899_v37 = vpop.f32.mrb[12].mxu1 }
 0x271   :  { %v11901_v40 = vpop.f32.mrb[13].mxu1 }
 0x274   :  { %v11903_v44 = vpop.f32.mrb[14].mxu1 }
 0x275   :  { %v11905_v46 = vpop.f32.mrb[15].mxu1 }
 0x278   :  { %v11907_v51 = vpop.f32.mrb[16].mxu1 }
 0x279   :  { %v11909_v42 = vpop.f32.mrb[17].mxu1 }
 0x27c   :  { %v11911_v39 = vpop.f32.mrb[18].mxu1 }
 0x27d   :  { %v11913_v35 = vpop.f32.mrb[19].mxu1 }
 0x280   :  { %v11915_v31 = vpop.f32.mrb[20].mxu1 }
 0x281   :  { %v11917_v27 = vpop.f32.mrb[21].mxu1 }
 0x284   :  { %v11919_v22 = vpop.f32.mrb[22].mxu1 }
 0x285   :  { %v11921_v18 = vpop.f32.mrb[23].mxu1 }
 0x288   :  { %v11923_v14 = vpop.f32.mrb[24].mxu1 }
 0x289   :  { %v11925_v10 = vpop.f32.mrb[25].mxu1 }
 0x28c   :  { %v11927_v26 = vpop.f32.mrb[26].mxu1 }
 0x28d   :  { %v11929_v63 = vpop.f32.mrb[27].mxu1 }
 0x290   :  { %v11931_v21 = vpop.f32.mrb[28].mxu1 }
 0x291   :  { %v11933_v38 = vpop.f32.mrb[29].mxu1 }
 0x294   :  { %v11935_v1 = vpop.f32.mrb[30].mxu1 }
 0x295   :  { %v11937_v59 = vpop.f32.mrb[31].mxu1 }
 0x299   :  { %v8847_v41 = vpop.f32.mrb[0].mxu0 }
 0x29a   :  { %v8943_v61 = vadd.f32 %v8847_v41, %v8357_v57  ;;  %v5897_v5 = vpop.f32.mrb[1].mxu0 }
 0x29b   :  { %v8944_v48 = vadd.f32 %v5897_v5, %v2346_v55 }
 0x29c   :  { %v6288_v52 = vadd.f32 %v8943_v61, %v11942_v54 }
 0x29d   :  { %v6287_v58 = vadd.f32 %v8944_v48, %v11942_v54  ;;  %v8850_v62 = vpop.f32.mrb[2].mxu0 }
 0x29e   :  { %v6352_v3 = vmax.f32 %v6288_v52, 0.0  ;;  %v8945_v7 = vadd.f32 %v8850_v62, %v8360_v47  ;;  %v5907_v11 = vpop.f32.mrb[3].mxu0 }
 0x29f   :  { %v6351_v15 = vmax.f32 %v6287_v58, 0.0  ;;  %v8946_v19 = vadd.f32 %v5907_v11, %v2356_v2 }
 0x2a0   :  { %6417 = vst.msk [vmem:[#allocation2 + $0x8] sm:$0xff] %vm6415_vm2, %v6352_v3  ;;  %v6290_v23 = vadd.f32 %v8945_v7, %v11942_v54 }
 0x2a1   :  { %6416 = vst.msk [vmem:[#allocation2] sm:$0xff] %vm6415_vm2, %v6351_v15  ;;  %v6289_v28 = vadd.f32 %v8946_v19, %v11942_v54  ;;  %v8853_v32 = vpop.f32.mrb[4].mxu0 }
 0x2a2   :  { %v6354_v36 = vmax.f32 %v6290_v23, 0.0  ;;  %v8947_v53 = vadd.f32 %v8853_v32, %v8363_v4  ;;  %v5917_v6 = vpop.f32.mrb[5].mxu0 }
 0x2a3   :  { %v6353_v43 = vmax.f32 %v6289_v28, 0.0  ;;  %v8948_v50 = vadd.f32 %v5917_v6, %v2366_v8 }
 0x2a4   :  { %6419 = vst.msk [vmem:[#allocation2 + $0x18] sm:$0xff] %vm6415_vm2, %v6354_v36  ;;  %v6292_v56 = vadd.f32 %v8947_v53, %v11942_v54 }
 0x2a5   :  { %6418 = vst.msk [vmem:[#allocation2 + $0x10] sm:$0xff] %vm6415_vm2, %v6353_v43  ;;  %v6291_v0 = vadd.f32 %v8948_v50, %v11942_v54  ;;  %v8856_v9 = vpop.f32.mrb[6].mxu0 }
 0x2a6   :  { %v6356_v17 = vmax.f32 %v6292_v56, 0.0  ;;  %v8949_v25 = vadd.f32 %v8856_v9, %v8366_v12  ;;  %v5927_v34 = vpop.f32.mrb[7].mxu0 }
 0x2a7   :  { %v6355_v49 = vmax.f32 %v6291_v0, 0.0  ;;  %v8950_v13 = vadd.f32 %v5927_v34, %v2376_v16 }
 0x2a8   :  { %6421 = vst.msk [vmem:[#allocation2 + $0x28] sm:$0xff] %vm6415_vm2, %v6356_v17  ;;  %v6294_v45 = vadd.f32 %v8949_v25, %v11942_v54 }
 0x2a9   :  { %6420 = vst.msk [vmem:[#allocation2 + $0x20] sm:$0xff] %vm6415_vm2, %v6355_v49  ;;  %v6293_v60 = vadd.f32 %v8950_v13, %v11942_v54  ;;  %v8859_v30 = vpop.f32.mrb[8].mxu0 }
 0x2aa   :  { %v6358_v57 = vmax.f32 %v6294_v45, 0.0  ;;  %v8951_v55 = vadd.f32 %v8859_v30, %v11891_v20  ;;  %v5937_v47 = vpop.f32.mrb[9].mxu0 }
 0x2ab   :  { %v6357_v2 = vmax.f32 %v6293_v60, 0.0  ;;  %v8952_v4 = vadd.f32 %v5937_v47, %v11893_v24 }
 0x2ac   :  { %6423 = vst.msk [vmem:[#allocation2 + $0x38] sm:$0xff] %vm6415_vm2, %v6358_v57  ;;  %v6296_v8 = vadd.f32 %v8951_v55, %v11942_v54 }
 0x2ad   :  { %6422 = vst.msk [vmem:[#allocation2 + $0x30] sm:$0xff] %vm6415_vm2, %v6357_v2  ;;  %v6295_v12 = vadd.f32 %v8952_v4, %v11942_v54  ;;  %v8862_v16 = vpop.f32.mrb[10].mxu0 }
 0x2ae   :  { %v6360_v41 = vmax.f32 %v6296_v8, 0.0  ;;  %v8953_v61 = vadd.f32 %v8862_v16, %v11895_v29  ;;  %v5947_v5 = vpop.f32.mrb[11].mxu0 }
 0x2af   :  { %v6359_v48 = vmax.f32 %v6295_v12, 0.0  ;;  %v8954_v20 = vadd.f32 %v5947_v5, %v11897_v33 }
 0x2b0   :  { %6425 = vst.msk [vmem:[#allocation2 + $0x48] sm:$0xff] %vm6415_vm2, %v6360_v41  ;;  %v6298_v24 = vadd.f32 %v8953_v61, %v11942_v54 }
 0x2b1   :  { %6424 = vst.msk [vmem:[#allocation2 + $0x40] sm:$0xff] %vm6415_vm2, %v6359_v48  ;;  %v6297_v52 = vadd.f32 %v8954_v20, %v11942_v54  ;;  %v8865_v58 = vpop.f32.mrb[12].mxu0 }
 0x2b2   :  { %v6362_v62 = vmax.f32 %v6298_v24, 0.0  ;;  %v8955_v3 = vadd.f32 %v8865_v58, %v11899_v37  ;;  %v5957_v7 = vpop.f32.mrb[13].mxu0 }
 0x2b3   :  { %v6361_v11 = vmax.f32 %v6297_v52, 0.0  ;;  %v8956_v29 = vadd.f32 %v5957_v7, %v11901_v40 }
 0x2b4   :  { %6427 = vst.msk [vmem:[#allocation2 + $0x58] sm:$0xff] %vm6415_vm2, %v6362_v62  ;;  %v6300_v33 = vadd.f32 %v8955_v3, %v11942_v54 }
 0x2b5   :  { %6426 = vst.msk [vmem:[#allocation2 + $0x50] sm:$0xff] %vm6415_vm2, %v6361_v11  ;;  %v6299_v15 = vadd.f32 %v8956_v29, %v11942_v54  ;;  %v8868_v19 = vpop.f32.mrb[14].mxu0 }
 0x2b6   :  { %v6364_v23 = vmax.f32 %v6300_v33, 0.0  ;;  %v8957_v28 = vadd.f32 %v8868_v19, %v11903_v44  ;;  %v5967_v32 = vpop.f32.mrb[15].mxu0 }
 0x2b7   :  { %v6363_v36 = vmax.f32 %v6299_v15, 0.0  ;;  %v8958_v37 = vadd.f32 %v5967_v32, %v11905_v46 }
 0x2b8   :  { %6429 = vst.msk [vmem:[#allocation2 + $0x68] sm:$0xff] %vm6415_vm2, %v6364_v23  ;;  %v6302_v40 = vadd.f32 %v8957_v28, %v11942_v54 }
 0x2b9   :  { %6428 = vst.msk [vmem:[#allocation2 + $0x60] sm:$0xff] %vm6415_vm2, %v6363_v36  ;;  %v6301_v53 = vadd.f32 %v8958_v37, %v11942_v54  ;;  %v8871_v6 = vpop.f32.mrb[16].mxu0 }
 0x2ba   :  { %v6366_v43 = vmax.f32 %v6302_v40, 0.0  ;;  %v8959_v50 = vadd.f32 %v8871_v6, %v11907_v51  ;;  %v5977_v56 = vpop.f32.mrb[17].mxu0 }
 0x2bb   :  { %v6365_v0 = vmax.f32 %v6301_v53, 0.0  ;;  %v8960_v44 = vadd.f32 %v5977_v56, %v11909_v42 }
 0x2bc   :  { %6431 = vst.msk [vmem:[#allocation2 + $0x78] sm:$0xff] %vm6415_vm2, %v6366_v43  ;;  %v6304_v46 = vadd.f32 %v8959_v50, %v11942_v54 }
 0x2bd   :  { %6430 = vst.msk [vmem:[#allocation2 + $0x70] sm:$0xff] %vm6415_vm2, %v6365_v0  ;;  %v6303_v9 = vadd.f32 %v8960_v44, %v11942_v54  ;;  %v8874_v17 = vpop.f32.mrb[18].mxu0 }
 0x2be   :  { %v6368_v25 = vmax.f32 %v6304_v46, 0.0  ;;  %v8961_v34 = vadd.f32 %v8874_v17, %v11911_v39  ;;  %v5987_v49 = vpop.f32.mrb[19].mxu0 }
 0x2bf   :  { %v6367_v13 = vmax.f32 %v6303_v9, 0.0  ;;  %v8962_v51 = vadd.f32 %v5987_v49, %v11913_v35 }
 0x2c0   :  { %6433 = vst.msk [vmem:[#allocation2 + $0x88] sm:$0xff] %vm6415_vm2, %v6368_v25  ;;  %v6306_v42 = vadd.f32 %v8961_v34, %v11942_v54 }
 0x2c1   :  { %6432 = vst.msk [vmem:[#allocation2 + $0x80] sm:$0xff] %vm6415_vm2, %v6367_v13  ;;  %v6305_v45 = vadd.f32 %v8962_v51, %v11942_v54  ;;  %v8877_v60 = vpop.f32.mrb[20].mxu0 }
 0x2c2   :  { %v6370_v30 = vmax.f32 %v6306_v42, 0.0  ;;  %v8963_v57 = vadd.f32 %v8877_v60, %v11915_v31  ;;  %v5997_v55 = vpop.f32.mrb[21].mxu0 }
 0x2c3   :  { %v6369_v47 = vmax.f32 %v6305_v45, 0.0  ;;  %v8964_v39 = vadd.f32 %v5997_v55, %v11917_v27 }
 0x2c4   :  { %6435 = vst.msk [vmem:[#allocation2 + $0x98] sm:$0xff] %vm6415_vm2, %v6370_v30  ;;  %v6308_v35 = vadd.f32 %v8963_v57, %v11942_v54 }
 0x2c5   :  { %6434 = vst.msk [vmem:[#allocation2 + $0x90] sm:$0xff] %vm6415_vm2, %v6369_v47  ;;  %v6307_v2 = vadd.f32 %v8964_v39, %v11942_v54  ;;  %v8880_v4 = vpop.f32.mrb[22].mxu0 }
 0x2c6   :  { %v6372_v8 = vmax.f32 %v6308_v35, 0.0  ;;  %v8965_v12 = vadd.f32 %v8880_v4, %v11919_v22  ;;  %v6007_v16 = vpop.f32.mrb[23].mxu0 }
 0x2c7   :  { %v6371_v41 = vmax.f32 %v6307_v2, 0.0  ;;  %v8966_v31 = vadd.f32 %v6007_v16, %v11921_v18 }
 0x2c8   :  { %6437 = vst.msk [vmem:[#allocation2 + $0xa8] sm:$0xff] %vm6415_vm2, %v6372_v8  ;;  %v6310_v27 = vadd.f32 %v8965_v12, %v11942_v54 }
 0x2c9   :  { %6436 = vst.msk [vmem:[#allocation2 + $0xa0] sm:$0xff] %vm6415_vm2, %v6371_v41  ;;  %v6309_v61 = vadd.f32 %v8966_v31, %v11942_v54  ;;  %v8883_v5 = vpop.f32.mrb[24].mxu0 }
 0x2ca   :  { %v6374_v48 = vmax.f32 %v6310_v27, 0.0  ;;  %v8967_v20 = vadd.f32 %v8883_v5, %v11923_v14  ;;  %v6017_v24 = vpop.f32.mrb[25].mxu0 }
 0x2cb   :  { %v6373_v52 = vmax.f32 %v6309_v61, 0.0  ;;  %v8968_v22 = vadd.f32 %v6017_v24, %v11925_v10 }
 0x2cc   :  { %6439 = vst.msk [vmem:[#allocation2 + $0xb8] sm:$0xff] %vm6415_vm2, %v6374_v48  ;;  %v6312_v18 = vadd.f32 %v8967_v20, %v11942_v54 }
 0x2cd   :  { %6438 = vst.msk [vmem:[#allocation2 + $0xb0] sm:$0xff] %vm6415_vm2, %v6373_v52  ;;  %v6311_v58 = vadd.f32 %v8968_v22, %v11942_v54  ;;  %v8886_v62 = vpop.f32.mrb[26].mxu0 }
 0x2ce   :  { %v6376_v3 = vmax.f32 %v6312_v18, 0.0  ;;  %v8969_v7 = vadd.f32 %v8886_v62, %v11927_v26  ;;  %v6027_v11 = vpop.f32.mrb[27].mxu0 }
 0x2cf   :  { %v6375_v29 = vmax.f32 %v6311_v58, 0.0  ;;  %v8970_v14 = vadd.f32 %v6027_v11, %v11929_v63 }
 0x2d0   :  { %6441 = vst.msk [vmem:[#allocation2 + $0xc8] sm:$0xff] %vm6415_vm2, %v6376_v3  ;;  %v6314_v10 = vadd.f32 %v8969_v7, %v11942_v54 }
 0x2d1   :  { %6440 = vst.msk [vmem:[#allocation2 + $0xc0] sm:$0xff] %vm6415_vm2, %v6375_v29  ;;  %v6313_v33 = vadd.f32 %v8970_v14, %v11942_v54  ;;  %v8889_v15 = vpop.f32.mrb[28].mxu0 }
 0x2d2   :  { %v6378_v19 = vmax.f32 %v6314_v10, 0.0  ;;  %v8971_v23 = vadd.f32 %v8889_v15, %v11931_v21  ;;  %v6037_v28 = vpop.f32.mrb[29].mxu0 }
 0x2d3   :  { %v6377_v32 = vmax.f32 %v6313_v33, 0.0  ;;  %v8972_v26 = vadd.f32 %v6037_v28, %v11933_v38 }
 0x2d4   :  { %6443 = vst.msk [vmem:[#allocation2 + $0xd8] sm:$0xff] %vm6415_vm2, %v6378_v19  ;;  %v6316_v63 = vadd.f32 %v8971_v23, %v11942_v54 }
 0x2d5   :  { %6442 = vst.msk [vmem:[#allocation2 + $0xd0] sm:$0xff] %vm6415_vm2, %v6377_v32  ;;  %v6315_v36 = vadd.f32 %v8972_v26, %v11942_v54  ;;  %v8892_v37 = vpop.f32.mrb[30].mxu0 }
 0x2d6   :  { %v6380_v40 = vmax.f32 %v6316_v63, 0.0  ;;  %v8973_v53 = vadd.f32 %v8892_v37, %v11935_v1  ;;  %v6047_v6 = vpop.f32.mrb[31].mxu0 }
 0x2d7   :  { %v6379_v43 = vmax.f32 %v6315_v36, 0.0  ;;  %v8974_v21 = vadd.f32 %v6047_v6, %v11937_v59 }
 0x2d8   :  { %6445 = vst.msk [vmem:[#allocation2 + $0xe8] sm:$0xff] %vm6415_vm2, %v6380_v40  ;;  %v6318_v38 = vadd.f32 %v8973_v53, %v11942_v54  ;;  %v8503_v50 = vpop.f32.mrb[32].mxu1 }
 0x2d9   :  { %6444 = vst.msk [vmem:[#allocation2 + $0xe0] sm:$0xff] %vm6415_vm2, %v6379_v43  ;;  %v6317_v56 = vadd.f32 %v8974_v21, %v11942_v54  ;;  %v8895_v0 = vpop.f32.mrb[32].mxu0  ;;  %v3216_v44 = vpop.f32.mrb[33].mxu1 }
 0x2da   :  { %v6382_v46 = vmax.f32 %v6318_v38, 0.0  ;;  %v8975_v9 = vadd.f32 %v8895_v0, %v8503_v50  ;;  %v6057_v17 = vpop.f32.mrb[33].mxu0 }
 0x2db   :  { %v6381_v25 = vmax.f32 %v6317_v56, 0.0  ;;  %v8976_v1 = vadd.f32 %v6057_v17, %v3216_v44 }
 0x2dc   :  { %6447 = vst.msk [vmem:[#allocation2 + $0xf8] sm:$0xff] %vm6415_vm2, %v6382_v46  ;;  %v6320_v59 = vadd.f32 %v8975_v9, %v11942_v54  ;;  %v8506_v34 = vpop.f32.mrb[34].mxu1 }
 0x2dd   :  { %6446 = vst.msk [vmem:[#allocation2 + $0xf0] sm:$0xff] %vm6415_vm2, %v6381_v25  ;;  %v6319_v49 = vadd.f32 %v8976_v1, %v11942_v54  ;;  %v8898_v13 = vpop.f32.mrb[34].mxu0  ;;  %v3226_v51 = vpop.f32.mrb[35].mxu1 }
 0x2de   :  { %v6384_v42 = vmax.f32 %v6320_v59, 0.0  ;;  %v8977_v45 = vadd.f32 %v8898_v13, %v8506_v34  ;;  %v6067_v60 = vpop.f32.mrb[35].mxu0 }
 0x2df   :  { %v6383_v30 = vmax.f32 %v6319_v49, 0.0  ;;  %v8978_v57 = vadd.f32 %v6067_v60, %v3226_v51 }
 0x2e0   :  { %6449 = vst.msk [vmem:[#allocation2 + $0x108] sm:$0xff] %vm6415_vm2, %v6384_v42  ;;  %v6322_v55 = vadd.f32 %v8977_v45, %v11942_v54  ;;  %v8509_v47 = vpop.f32.mrb[36].mxu1 }
 0x2e1   :  { %6448 = vst.msk [vmem:[#allocation2 + $0x100] sm:$0xff] %vm6415_vm2, %v6383_v30  ;;  %v6321_v39 = vadd.f32 %v8978_v57, %v11942_v54  ;;  %v8901_v35 = vpop.f32.mrb[36].mxu0  ;;  %v3236_v2 = vpop.f32.mrb[37].mxu1 }
 0x2e2   :  { %v6386_v4 = vmax.f32 %v6322_v55, 0.0  ;;  %v8979_v8 = vadd.f32 %v8901_v35, %v8509_v47  ;;  %v6077_v12 = vpop.f32.mrb[37].mxu0 }
 0x2e3   :  { %v6385_v16 = vmax.f32 %v6321_v39, 0.0  ;;  %v8980_v41 = vadd.f32 %v6077_v12, %v3236_v2 }
 0x2e4   :  { %6451 = vst.msk [vmem:[#allocation2 + $0x118] sm:$0xff] %vm6415_vm2, %v6386_v4  ;;  %v6324_v31 = vadd.f32 %v8979_v8, %v11942_v54  ;;  %v8512_v27 = vpop.f32.mrb[38].mxu1 }
 0x2e5   :  { %6450 = vst.msk [vmem:[#allocation2 + $0x110] sm:$0xff] %vm6415_vm2, %v6385_v16  ;;  %v6323_v61 = vadd.f32 %v8980_v41, %v11942_v54  ;;  %v8904_v5 = vpop.f32.mrb[38].mxu0  ;;  %v3246_v48 = vpop.f32.mrb[39].mxu1 }
 0x2e6   :  { %v6388_v20 = vmax.f32 %v6324_v31, 0.0  ;;  %v8981_v24 = vadd.f32 %v8904_v5, %v8512_v27  ;;  %v6087_v52 = vpop.f32.mrb[39].mxu0 }
 0x2e7   :  { %v6387_v22 = vmax.f32 %v6323_v61, 0.0  ;;  %v8982_v18 = vadd.f32 %v6087_v52, %v3246_v48 }
 0x2e8   :  { %6453 = vst.msk [vmem:[#allocation2 + $0x128] sm:$0xff] %vm6415_vm2, %v6388_v20  ;;  %v6326_v58 = vadd.f32 %v8981_v24, %v11942_v54  ;;  %v8515_v62 = vpop.f32.mrb[40].mxu1 }
 0x2e9   :  { %6452 = vst.msk [vmem:[#allocation2 + $0x120] sm:$0xff] %vm6415_vm2, %v6387_v22  ;;  %v6325_v3 = vadd.f32 %v8982_v18, %v11942_v54  ;;  %v8907_v7 = vpop.f32.mrb[40].mxu0  ;;  %v3256_v11 = vpop.f32.mrb[41].mxu1 }
 0x2ea   :  { %v6390_v29 = vmax.f32 %v6326_v58, 0.0  ;;  %v8983_v14 = vadd.f32 %v8907_v7, %v8515_v62  ;;  %v6097_v10 = vpop.f32.mrb[41].mxu0 }
 0x2eb   :  { %v6389_v33 = vmax.f32 %v6325_v3, 0.0  ;;  %v8984_v15 = vadd.f32 %v6097_v10, %v3256_v11 }
 0x2ec   :  { %6455 = vst.msk [vmem:[#allocation2 + $0x138] sm:$0xff] %vm6415_vm2, %v6390_v29  ;;  %v6328_v19 = vadd.f32 %v8983_v14, %v11942_v54  ;;  %v8518_v23 = vpop.f32.mrb[42].mxu1 }
 0x2ed   :  { %6454 = vst.msk [vmem:[#allocation2 + $0x130] sm:$0xff] %vm6415_vm2, %v6389_v33  ;;  %v6327_v28 = vadd.f32 %v8984_v15, %v11942_v54  ;;  %v8910_v32 = vpop.f32.mrb[42].mxu0  ;;  %v3266_v26 = vpop.f32.mrb[43].mxu1 }
 0x2ee   :  { %v6392_v63 = vmax.f32 %v6328_v19, 0.0  ;;  %v8985_v36 = vadd.f32 %v8910_v32, %v8518_v23  ;;  %v6107_v37 = vpop.f32.mrb[43].mxu0 }
 0x2ef   :  { %v6391_v40 = vmax.f32 %v6327_v28, 0.0  ;;  %v8986_v53 = vadd.f32 %v6107_v37, %v3266_v26 }
 0x2f0   :  { %6457 = vst.msk [vmem:[#allocation2 + $0x148] sm:$0xff] %vm6415_vm2, %v6392_v63  ;;  %v6330_v6 = vadd.f32 %v8985_v36, %v11942_v54  ;;  %v8521_v43 = vpop.f32.mrb[44].mxu1 }
 0x2f1   :  { %6456 = vst.msk [vmem:[#allocation2 + $0x140] sm:$0xff] %vm6415_vm2, %v6391_v40  ;;  %v6329_v21 = vadd.f32 %v8986_v53, %v11942_v54  ;;  %v8913_v38 = vpop.f32.mrb[44].mxu0  ;;  %v3276_v50 = vpop.f32.mrb[45].mxu1 }
 0x2f2   :  { %v6394_v56 = vmax.f32 %v6330_v6, 0.0  ;;  %v8987_v0 = vadd.f32 %v8913_v38, %v8521_v43  ;;  %v6117_v44 = vpop.f32.mrb[45].mxu0 }
 0x2f3   :  { %v6393_v46 = vmax.f32 %v6329_v21, 0.0  ;;  %v8988_v9 = vadd.f32 %v6117_v44, %v3276_v50 }
 0x2f4   :  { %6459 = vst.msk [vmem:[#allocation2 + $0x158] sm:$0xff] %vm6415_vm2, %v6394_v56  ;;  %v6332_v17 = vadd.f32 %v8987_v0, %v11942_v54  ;;  %v8524_v25 = vpop.f32.mrb[46].mxu1 }
 0x2f5   :  { %6458 = vst.msk [vmem:[#allocation2 + $0x150] sm:$0xff] %vm6415_vm2, %v6393_v46  ;;  %v6331_v1 = vadd.f32 %v8988_v9, %v11942_v54  ;;  %v8916_v59 = vpop.f32.mrb[46].mxu0  ;;  %v3286_v34 = vpop.f32.mrb[47].mxu1 }
 0x2f6   :  { %v6396_v49 = vmax.f32 %v6332_v17, 0.0  ;;  %v8989_v13 = vadd.f32 %v8916_v59, %v8524_v25  ;;  %v6127_v51 = vpop.f32.mrb[47].mxu0 }
 0x2f7   :  { %v6395_v42 = vmax.f32 %v6331_v1, 0.0  ;;  %v8990_v45 = vadd.f32 %v6127_v51, %v3286_v34 }
 0x2f8   :  { %6461 = vst.msk [vmem:[#allocation2 + $0x168] sm:$0xff] %vm6415_vm2, %v6396_v49  ;;  %v6334_v60 = vadd.f32 %v8989_v13, %v11942_v54  ;;  %v8527_v30 = vpop.f32.mrb[48].mxu1 }
 0x2f9   :  { %6460 = vst.msk [vmem:[#allocation2 + $0x160] sm:$0xff] %vm6415_vm2, %v6395_v42  ;;  %v6333_v57 = vadd.f32 %v8990_v45, %v11942_v54  ;;  %v8919_v55 = vpop.f32.mrb[48].mxu0  ;;  %v3296_v47 = vpop.f32.mrb[49].mxu1 }
 0x2fa   :  { %v6398_v39 = vmax.f32 %v6334_v60, 0.0  ;;  %v8991_v35 = vadd.f32 %v8919_v55, %v8527_v30  ;;  %v6137_v2 = vpop.f32.mrb[49].mxu0 }
 0x2fb   :  { %v6397_v4 = vmax.f32 %v6333_v57, 0.0  ;;  %v8992_v8 = vadd.f32 %v6137_v2, %v3296_v47 }
 0x2fc   :  { %6463 = vst.msk [vmem:[#allocation2 + $0x178] sm:$0xff] %vm6415_vm2, %v6398_v39  ;;  %v6336_v12 = vadd.f32 %v8991_v35, %v11942_v54  ;;  %v8530_v16 = vpop.f32.mrb[50].mxu1 }
 0x2fd   :  { %6462 = vst.msk [vmem:[#allocation2 + $0x170] sm:$0xff] %vm6415_vm2, %v6397_v4  ;;  %v6335_v41 = vadd.f32 %v8992_v8, %v11942_v54  ;;  %v8922_v31 = vpop.f32.mrb[50].mxu0  ;;  %v3306_v27 = vpop.f32.mrb[51].mxu1 }
 0x2fe   :  { %v6400_v61 = vmax.f32 %v6336_v12, 0.0  ;;  %v8993_v5 = vadd.f32 %v8922_v31, %v8530_v16  ;;  %v6147_v48 = vpop.f32.mrb[51].mxu0 }
 0x2ff   :  { %v6399_v20 = vmax.f32 %v6335_v41, 0.0  ;;  %v8994_v24 = vadd.f32 %v6147_v48, %v3306_v27 }
 0x300   :  { %6465 = vst.msk [vmem:[#allocation2 + $0x188] sm:$0xff] %vm6415_vm2, %v6400_v61  ;;  %v6338_v52 = vadd.f32 %v8993_v5, %v11942_v54  ;;  %v8533_v22 = vpop.f32.mrb[52].mxu1 }
 0x301   :  { %6464 = vst.msk [vmem:[#allocation2 + $0x180] sm:$0xff] %vm6415_vm2, %v6399_v20  ;;  %v6337_v18 = vadd.f32 %v8994_v24, %v11942_v54  ;;  %v8925_v58 = vpop.f32.mrb[52].mxu0  ;;  %v3316_v62 = vpop.f32.mrb[53].mxu1 }
 0x302   :  { %v6402_v3 = vmax.f32 %v6338_v52, 0.0  ;;  %v8995_v7 = vadd.f32 %v8925_v58, %v8533_v22  ;;  %v6157_v11 = vpop.f32.mrb[53].mxu0 }
 0x303   :  { %v6401_v29 = vmax.f32 %v6337_v18, 0.0  ;;  %v8996_v14 = vadd.f32 %v6157_v11, %v3316_v62 }
 0x304   :  { %6467 = vst.msk [vmem:[#allocation2 + $0x198] sm:$0xff] %vm6415_vm2, %v6402_v3  ;;  %v6340_v10 = vadd.f32 %v8995_v7, %v11942_v54  ;;  %v8536_v33 = vpop.f32.mrb[54].mxu1 }
 0x305   :  { %6466 = vst.msk [vmem:[#allocation2 + $0x190] sm:$0xff] %vm6415_vm2, %v6401_v29  ;;  %v6339_v15 = vadd.f32 %v8996_v14, %v11942_v54  ;;  %v8928_v19 = vpop.f32.mrb[54].mxu0  ;;  %v3326_v23 = vpop.f32.mrb[55].mxu1 }
 0x306   :  { %v6404_v28 = vmax.f32 %v6340_v10, 0.0  ;;  %v8997_v32 = vadd.f32 %v8928_v19, %v8536_v33  ;;  %v6167_v26 = vpop.f32.mrb[55].mxu0 }
 0x307   :  { %v6403_v63 = vmax.f32 %v6339_v15, 0.0  ;;  %v8998_v36 = vadd.f32 %v6167_v26, %v3326_v23 }
 0x308   :  { %6469 = vst.msk [vmem:[#allocation2 + $0x1a8] sm:$0xff] %vm6415_vm2, %v6404_v28  ;;  %v6342_v37 = vadd.f32 %v8997_v32, %v11942_v54  ;;  %v8539_v40 = vpop.f32.mrb[56].mxu1 }
 0x309   :  { %6468 = vst.msk [vmem:[#allocation2 + $0x1a0] sm:$0xff] %vm6415_vm2, %v6403_v63  ;;  %v6341_v53 = vadd.f32 %v8998_v36, %v11942_v54  ;;  %v8931_v6 = vpop.f32.mrb[56].mxu0  ;;  %v3336_v43 = vpop.f32.mrb[57].mxu1 }
 0x30a   :  { %v6406_v21 = vmax.f32 %v6342_v37, 0.0  ;;  %v8999_v38 = vadd.f32 %v8931_v6, %v8539_v40  ;;  %v6177_v50 = vpop.f32.mrb[57].mxu0 }
 0x30b   :  { %v6405_v56 = vmax.f32 %v6341_v53, 0.0  ;;  %v9000_v0 = vadd.f32 %v6177_v50, %v3336_v43 }
 0x30c   :  { %6471 = vst.msk [vmem:[#allocation2 + $0x1b8] sm:$0xff] %vm6415_vm2, %v6406_v21  ;;  %v6344_v44 = vadd.f32 %v8999_v38, %v11942_v54  ;;  %v8542_v46 = vpop.f32.mrb[58].mxu1 }
 0x30d   :  { %6470 = vst.msk [vmem:[#allocation2 + $0x1b0] sm:$0xff] %vm6415_vm2, %v6405_v56  ;;  %v6343_v9 = vadd.f32 %v9000_v0, %v11942_v54  ;;  %v8934_v17 = vpop.f32.mrb[58].mxu0  ;;  %v3346_v25 = vpop.f32.mrb[59].mxu1 }
 0x30e   :  { %v6408_v1 = vmax.f32 %v6344_v44, 0.0  ;;  %v9001_v59 = vadd.f32 %v8934_v17, %v8542_v46  ;;  %v6187_v34 = vpop.f32.mrb[59].mxu0 }
 0x30f   :  { %v6407_v49 = vmax.f32 %v6343_v9, 0.0  ;;  %v9002_v13 = vadd.f32 %v6187_v34, %v3346_v25 }
 0x310   :  { %6473 = vst.msk [vmem:[#allocation2 + $0x1c8] sm:$0xff] %vm6415_vm2, %v6408_v1  ;;  %v6346_v51 = vadd.f32 %v9001_v59, %v11942_v54  ;;  %v8545_v42 = vpop.f32.mrb[60].mxu1 }
 0x311   :  { %6472 = vst.msk [vmem:[#allocation2 + $0x1c0] sm:$0xff] %vm6415_vm2, %v6407_v49  ;;  %v6345_v45 = vadd.f32 %v9002_v13, %v11942_v54  ;;  %v8937_v60 = vpop.f32.mrb[60].mxu0  ;;  %v3356_v30 = vpop.f32.mrb[61].mxu1 }
 0x312   :  { %v6410_v57 = vmax.f32 %v6346_v51, 0.0  ;;  %v9003_v55 = vadd.f32 %v8937_v60, %v8545_v42  ;;  %v6197_v47 = vpop.f32.mrb[61].mxu0 }
 0x313   :  { %v6409_v39 = vmax.f32 %v6345_v45, 0.0  ;;  %v9004_v35 = vadd.f32 %v6197_v47, %v3356_v30 }
 0x314   :  { %6475 = vst.msk [vmem:[#allocation2 + $0x1d8] sm:$0xff] %vm6415_vm2, %v6410_v57  ;;  %v6348_v2 = vadd.f32 %v9003_v55, %v11942_v54  ;;  %v8548_v4 = vpop.f32.mrb[62].mxu1 }
 0x315   :  { %6474 = vst.msk [vmem:[#allocation2 + $0x1d0] sm:$0xff] %vm6415_vm2, %v6409_v39  ;;  %v6347_v8 = vadd.f32 %v9004_v35, %v11942_v54  ;;  %v8940_v12 = vpop.f32.mrb[62].mxu0  ;;  %v3366_v16 = vpop.f32.mrb[63].mxu1 }
 0x316   :  { %v6412_v41 = vmax.f32 %v6348_v2, 0.0  ;;  %v9005_v31 = vadd.f32 %v8940_v12, %v8548_v4  ;;  %v6207_v27 = vpop.f32.mrb[63].mxu0 }
 0x317   :  { %v6411_v61 = vmax.f32 %v6347_v8, 0.0  ;;  %v9006_v5 = vadd.f32 %v6207_v27, %v3366_v16 }
 0x318   :  { %6477 = vst.msk [vmem:[#allocation2 + $0x1e8] sm:$0xff] %vm6415_vm2, %v6412_v41  ;;  %v6350_v48 = vadd.f32 %v9005_v31, %v11942_v54 }
 0x319   :  { %6476 = vst.msk [vmem:[#allocation2 + $0x1e0] sm:$0xff] %vm6415_vm2, %v6411_v61  ;;  %v6349_v20 = vadd.f32 %v9006_v5, %v11942_v54 }
 0x31a   :  { %v6414_v24 = vmax.f32 %v6350_v48, 0.0 }
 0x31b   :  { %v6413_v52 = vmax.f32 %v6349_v20, 0.0 }
 0x31c   :  { %6479 = vst.msk [vmem:[#allocation2 + $0x1f8] sm:$0xff] %vm6415_vm2, %v6414_v24 }
 0x31d   :  { %6478 = vst.msk [vmem:[#allocation2 + $0x1f0] sm:$0xff] %vm6415_vm2, %v6413_v52 }
 0x31e   :  { %9470 = shalt.err (!%p9467_p4)
}
 0x31f   :  { %s9471_s4 = scalar_lea.hbm %s12111_s3, 8192 }
 0x320   :  { %p9472_p5 = scmp.ne.s32.totalorder %s12111_s3, %s9471_s4  ;;  %p9475_p6 = scmp.lt.u32.totalorder %s9471_s4, %s12111_s3 }
 0x322   :  { %p9477_p7 = pnand %p9475_p6, %p9472_p5 }
 0x324   :  { %9480 = shalt.err (!%p9477_p7)
}
 0x325   :  { %s9484_s9 = smov 128   ;;  %s9485_s10 = smov 8  }
 0x326   :  { %6491 = dma.vmem_to_hbm [thread:$0]  %s6486_s27, 8192, %s12111_s3, [#allocation3], %s9484_s9, %s9484_s9, %s9485_s10  }
 0x327   :  { %9481 = dma.done.wait [#allocation3], 8192  }
 0x328   :  { %9482 = vsyncadd [#allocation3], 4294959104 }
 0x329   :  { %6495 = vsyncpa [#allocation3], 1 }

</bundles_post_ra>
